<compile_context>
chip_gen: v5e
topology: v5e:2x2
jax: 0.10.0
libtpu: 0.0.40
codegen_flags: <defaults>
</compile_context>

<pallas_src>
import functools

import jax
import jax.numpy as jnp
from jax.experimental import pallas as pl
from jax.experimental.pallas import tpu as pltpu

# MXU operand dtype (accumulation is always f32 via preferred_element_type).
_MXU_DTYPE = jnp.bfloat16
_LN_EPS = 1e-5


def _pick_tile(dim, target, align):
    """Largest tile <= target that is a multiple of `align` and divides `dim`;
    falls back to the full dim (always legal for Pallas block shapes)."""
    if dim <= target:
        return dim
    for t in range(target, align - 1, -align):
        if dim % t == 0:
            return t
    return dim


def _vmem_capacity_bytes():
    try:
        return pltpu.get_tpu_info().vmem_capacity_bytes
    except Exception:
        return 64 << 20  # conservative (v7x-sized) fallback


# ----------------------------- Tiled linear (matmul + bias) -----------------

def _linear_kernel(x_ref, w_ref, b_ref, o_ref, acc_ref):
    @pl.when(pl.program_id(2) == 0)
    def _():
        acc_ref[...] = jnp.zeros_like(acc_ref)

    acc_ref[...] += jnp.dot(
        x_ref[...].astype(_MXU_DTYPE),
        w_ref[...],  # weights are already bf16 in HBM
        preferred_element_type=jnp.float32,
    )

    @pl.when(pl.program_id(2) == pl.num_programs(2) - 1)
    def _():
        o_ref[...] = (acc_ref[...] + b_ref[...]).astype(o_ref.dtype)


def linear(x, w, b, out_dtype=None, tm=None, tn=None, tk=None):
    """x: [M, K] (any float dtype), w: [K, N] bf16, b: [N] f32 -> x @ w + b.
    Tiled on an (M/tm, N/tn, K/tk) grid with an f32 VMEM accumulator."""
    if out_dtype is None:
        out_dtype = x.dtype
    M, K = x.shape
    N = w.shape[1]
    if tm is None or tn is None or tk is None:
        # Bigger tiles on the 128 MiB parts (v5e/v6e), conservative on v7x (64 MiB).
        big = _vmem_capacity_bytes() >= (100 << 20)
        _tm, _tn, _tk = (512, 512, 1024) if big else (256, 512, 512)
        tm = tm if tm is not None else _tm
        tn = tn if tn is not None else _tn
        tk = tk if tk is not None else _tk
    tm = _pick_tile(M, tm, 8)
    tn = _pick_tile(N, tn, 128)
    tk = _pick_tile(K, tk, 128)
    grid = (M // tm, N // tn, K // tk)
    return pl.pallas_call(
        _linear_kernel,
        out_shape=jax.ShapeDtypeStruct((M, N), out_dtype),
        grid=grid,
        in_specs=[
            pl.BlockSpec((tm, tk), lambda i, j, k: (i, k)),
            pl.BlockSpec((tk, tn), lambda i, j, k: (k, j)),
            pl.BlockSpec((1, tn), lambda i, j, k: (0, j)),
        ],
        out_specs=pl.BlockSpec((tm, tn), lambda i, j, k: (i, j)),
        scratch_shapes=[pltpu.VMEM((tm, tn), jnp.float32)],
        compiler_params=pltpu.CompilerParams(
            dimension_semantics=("parallel", "parallel", "arbitrary")),
    )(x, w, b.reshape(1, N))


# ----------------------------- Flash-style head-batched attention -----------

def _flash_attn_kernel(q_ref, k_ref, v_ref, msk_ref, o_ref,
                       m_sc, l_sc, acc_sc, *, scale):
    # One grid step = one batch element, one Tq tile, one Tk tile; all heads are
    # processed by a single batched einsum (head axis is a matmul batch dim).
    kv_idx = pl.program_id(2)

    @pl.when(kv_idx == 0)
    def _():
        m_sc[...] = jnp.full_like(m_sc, -jnp.inf)
        l_sc[...] = jnp.zeros_like(l_sc)
        acc_sc[...] = jnp.zeros_like(acc_sc)

    q = q_ref[0]                                    # [H, tq, dk]  bf16
    k = k_ref[0]                                    # [H, tk, dk]  bf16
    v = v_ref[0]                                    # [H, tk, dv]  bf16

    s = jnp.einsum("hqd,hkd->hqk", q, k,
                   preferred_element_type=jnp.float32) * jnp.float32(scale)
    # mask: 1 = keep, 0 = masked -> additive bias, broadcast over heads.
    bias = (1.0 - msk_ref[0].astype(jnp.float32)) * jnp.float32(-1e9)
    s = s + bias[None, :, :]

    m_prev = m_sc[...]                              # [H, tq, 1]
    m_new = jnp.maximum(m_prev, jnp.max(s, axis=-1, keepdims=True))
    alpha = jnp.exp(m_prev - m_new)
    p = jnp.exp(s - m_new)                          # [H, tq, tk]  f32
    l_sc[...] = alpha * l_sc[...] + jnp.sum(p, axis=-1, keepdims=True)
    acc_sc[...] = alpha * acc_sc[...] + jnp.einsum(
        "hqk,hkd->hqd", p.astype(v.dtype), v, preferred_element_type=jnp.float32)
    m_sc[...] = m_new

    @pl.when(kv_idx == pl.num_programs(2) - 1)
    def _():
        inv_l = pl.reciprocal(l_sc[...], approx=True)
        o_ref[0] = (acc_sc[...] * inv_l).astype(o_ref.dtype)


def flash_attention(q, k, v, mask, tq=256, tk=512):
    """q: [B, H, Tq, dk], k: [B, H, Tk, dk], v: [B, H, Tk, dv]  (bf16),
    mask: [B, Tq, Tk] (1 = keep).  Returns [B, H, Tq, dv] in q.dtype."""
    B, H, Tq, dk = q.shape
    Tk = k.shape[2]
    dv = v.shape[3]
    scale = 1.0 / float(dk) ** 0.5
    tq = _pick_tile(Tq, tq, 8)
    tk = _pick_tile(Tk, tk, 128)
    grid = (B, Tq // tq, Tk // tk)
    return pl.pallas_call(
        functools.partial(_flash_attn_kernel, scale=scale),
        out_shape=jax.ShapeDtypeStruct((B, H, Tq, dv), q.dtype),
        grid=grid,
        in_specs=[
            pl.BlockSpec((1, H, tq, dk), lambda b, qi, ki: (b, 0, qi, 0)),
            pl.BlockSpec((1, H, tk, dk), lambda b, qi, ki: (b, 0, ki, 0)),
            pl.BlockSpec((1, H, tk, dv), lambda b, qi, ki: (b, 0, ki, 0)),
            pl.BlockSpec((1, tq, tk), lambda b, qi, ki: (b, qi, ki)),
        ],
        out_specs=pl.BlockSpec((1, H, tq, dv), lambda b, qi, ki: (b, 0, qi, 0)),
        scratch_shapes=[
            pltpu.VMEM((H, tq, 1), jnp.float32),    # running max
            pltpu.VMEM((H, tq, 1), jnp.float32),    # running denom
            pltpu.VMEM((H, tq, dv), jnp.float32),   # context accumulator
        ],
        compiler_params=pltpu.CompilerParams(
            dimension_semantics=("parallel", "parallel", "arbitrary")),
    )(q, k, v, mask)


# ----------------- Fused: output projection + residual + LayerNorm ----------

def _proj_res_ln_kernel(ctx_ref, w_ref, b_ref, res_ref, g_ref, be_ref, o_ref, *, eps):
    y = jnp.dot(ctx_ref[...].astype(_MXU_DTYPE), w_ref[...],
                preferred_element_type=jnp.float32)
    y = y + b_ref[...] + res_ref[...].astype(jnp.float32)
    mu = jnp.mean(y, axis=-1, keepdims=True)
    diff = y - mu
    var = jnp.mean(diff * diff, axis=-1, keepdims=True)
    yn = diff * jax.lax.rsqrt(var + eps)
    o_ref[...] = (yn * g_ref[...] + be_ref[...]).astype(o_ref.dtype)


def proj_residual_layernorm(ctx, w, b, residual, gamma, beta, eps=_LN_EPS, tm=256):
    """(ctx @ w + b + residual) then LayerNorm over last dim.  Row-tiled grid."""
    M, Kd = ctx.shape
    D = w.shape[1]
    tm = _pick_tile(M, tm, 8)
    # TODO(synk): at very large D, raise vmem_limit_bytes (v5e default scoped
    # limit is 16 MiB) so the resident weight block fits.
    return pl.pallas_call(
        functools.partial(_proj_res_ln_kernel, eps=eps),
        out_shape=jax.ShapeDtypeStruct((M, D), residual.dtype),
        grid=(M // tm,),
        in_specs=[
            pl.BlockSpec((tm, Kd), lambda i: (i, 0)),
            pl.BlockSpec((Kd, D), lambda i: (0, 0)),
            pl.BlockSpec((1, D), lambda i: (0, 0)),
            pl.BlockSpec((tm, D), lambda i: (i, 0)),
            pl.BlockSpec((1, D), lambda i: (0, 0)),
            pl.BlockSpec((1, D), lambda i: (0, 0)),
        ],
        out_specs=pl.BlockSpec((tm, D), lambda i: (i, 0)),
        compiler_params=pltpu.CompilerParams(dimension_semantics=("parallel",)),
    )(ctx, w, b.reshape(1, D), residual, gamma.reshape(1, D), beta.reshape(1, D))


# --------- Fused FFN: w1 + ReLU + w2 (chunked over F) + residual + LayerNorm -

def _ffn_kernel(x_ref, w1_ref, b1_ref, w2_ref, b2_ref, g_ref, be_ref, o_ref,
                acc_ref, *, eps):
    @pl.when(pl.program_id(1) == 0)
    def _():
        acc_ref[...] = jnp.zeros_like(acc_ref)

    x = x_ref[...]
    h = jnp.dot(x.astype(_MXU_DTYPE), w1_ref[...],
                preferred_element_type=jnp.float32) + b1_ref[...]
    h = jnp.maximum(h, 0.0)
    acc_ref[...] += jnp.dot(h.astype(_MXU_DTYPE), w2_ref[...],
                            preferred_element_type=jnp.float32)

    @pl.when(pl.program_id(1) == pl.num_programs(1) - 1)
    def _():
        y = acc_ref[...] + b2_ref[...] + x_ref[...].astype(jnp.float32)
        mu = jnp.mean(y, axis=-1, keepdims=True)
        diff = y - mu
        var = jnp.mean(diff * diff, axis=-1, keepdims=True)
        yn = diff * jax.lax.rsqrt(var + eps)
        o_ref[...] = (yn * g_ref[...] + be_ref[...]).astype(o_ref.dtype)


def ffn_block(p, x, eps=_LN_EPS, tm=256, tf=512):
    """Position-wise FFN with fused residual + LayerNorm.  The d_ffn hidden
    activation never touches HBM; F is chunked on an 'arbitrary' grid axis."""
    B, T, D = x.shape
    F = p["w1"].shape[1]
    x2 = x.reshape(B * T, D)
    M = B * T
    tm = _pick_tile(M, tm, 8)
    tf = _pick_tile(F, tf, 128)
    out = pl.pallas_call(
        functools.partial(_ffn_kernel, eps=eps),
        out_shape=jax.ShapeDtypeStruct((M, D), x.dtype),
        grid=(M // tm, F // tf),
        in_specs=[
            pl.BlockSpec((tm, D), lambda i, f: (i, 0)),
            pl.BlockSpec((D, tf), lambda i, f: (0, f)),
            pl.BlockSpec((1, tf), lambda i, f: (0, f)),
            pl.BlockSpec((tf, D), lambda i, f: (f, 0)),
            pl.BlockSpec((1, D), lambda i, f: (0, 0)),
            pl.BlockSpec((1, D), lambda i, f: (0, 0)),
            pl.BlockSpec((1, D), lambda i, f: (0, 0)),
        ],
        out_specs=pl.BlockSpec((tm, D), lambda i, f: (i, 0)),
        scratch_shapes=[pltpu.VMEM((tm, D), jnp.float32)],
        compiler_params=pltpu.CompilerParams(
            dimension_semantics=("parallel", "arbitrary")),
    )(x2, p["w1"], p["b1"].reshape(1, F), p["w2"], p["b2"].reshape(1, D),
      p["ln_g"].reshape(1, D), p["ln_b"].reshape(1, D))
    return out.reshape(B, T, D)


# ----------------------------- Parameter init -------------------------------

def _init_linear(key, fan_in, fan_out):
    kw, kb = jax.random.split(key)
    bound = 1.0 / float(fan_in) ** 0.5
    w = jax.random.uniform(kw, (fan_in, fan_out), jnp.float32, -bound, bound)
    b = jax.random.uniform(kb, (fan_out,), jnp.float32, -bound, bound)
    # Weights live in HBM as bf16 (halves weight bandwidth); biases stay f32.
    return w.astype(_MXU_DTYPE), b


def init_mha_params(key, d_model, d_k, d_v, n_heads, fuse_qkv):
    ks = jax.random.split(key, 4)
    wq, bq = _init_linear(ks[0], d_model, n_heads * d_k)
    wk, bk = _init_linear(ks[1], d_model, n_heads * d_k)
    wv, bv = _init_linear(ks[2], d_model, n_heads * d_v)
    wo, bo = _init_linear(ks[3], n_heads * d_v, d_model)
    p = dict(wo=wo, bo=bo,
             ln_g=jnp.ones((d_model,), jnp.float32),
             ln_b=jnp.zeros((d_model,), jnp.float32))
    if fuse_qkv:
        # Self-attention: one fused QKV projection, columns = [Q | K | V].
        p["w_qkv"] = jnp.concatenate([wq, wk, wv], axis=1)
        p["b_qkv"] = jnp.concatenate([bq, bk, bv], axis=0)
    else:
        # Cross-attention: pre-split Q and fused KV (no runtime weight slicing).
        p["w_q"], p["b_q"] = wq, bq
        p["w_kv"] = jnp.concatenate([wk, wv], axis=1)
        p["b_kv"] = jnp.concatenate([bk, bv], axis=0)
    return p


def init_ffn_params(key, d_model, d_ffn):
    k1, k2 = jax.random.split(key)
    w1, b1 = _init_linear(k1, d_model, d_ffn)
    w2, b2 = _init_linear(k2, d_ffn, d_model)
    return dict(w1=w1, b1=b1, w2=w2, b2=b2,
                ln_g=jnp.ones((d_model,), jnp.float32),
                ln_b=jnp.zeros((d_model,), jnp.float32))


def init_decoder_params(key, dec_vocab_size, d_model, d_k, d_v, d_ffn, n_heads,
                        n_layers):
    keys = jax.random.split(key, n_layers + 1)
    layers = []
    for l in range(n_layers):
        k_sa, k_ca, k_ff = jax.random.split(keys[l], 3)
        layers.append(dict(
            self_attn=init_mha_params(k_sa, d_model, d_k, d_v, n_heads,
                                      fuse_qkv=True),
            cross_attn=init_mha_params(k_ca, d_model, d_k, d_v, n_heads,
                                       fuse_qkv=False),
            ffn=init_ffn_params(k_ff, d_model, d_ffn),
        ))
    w_out, b_out = _init_linear(keys[-1], d_model, dec_vocab_size)
    return dict(layers=layers, w_out=w_out, b_out=b_out)


# ----------------------------- Model (glue in JAX) ---------------------------

def multi_head_attention(p, x_q, x_kv, mask, n_heads, d_k, d_v, is_self):
    B, Tq, D = x_q.shape
    Tk = x_kv.shape[1]
    Hdk = n_heads * d_k
    Hdv = n_heads * d_v

    xq2 = x_q.reshape(B * Tq, D)
    if is_self:
        Tk = Tq
        # Single fused QKV projection (x_q == x_kv); bf16 output feeds the MXU.
        qkv = linear(xq2, p["w_qkv"], p["b_qkv"], out_dtype=_MXU_DTYPE)
        q2 = qkv[:, :Hdk]
        k2 = qkv[:, Hdk:2 * Hdk]
        v2 = qkv[:, 2 * Hdk:]
    else:
        # Q from decoder stream, fused KV from encoder output (pre-split weights).
        xkv2 = x_kv.reshape(B * Tk, D)
        q2 = linear(xq2, p["w_q"], p["b_q"], out_dtype=_MXU_DTYPE)
        kv = linear(xkv2, p["w_kv"], p["b_kv"], out_dtype=_MXU_DTYPE)
        k2 = kv[:, :Hdk]
        v2 = kv[:, Hdk:]

    # Pre-layout for the head-batched flash kernel: [B, H, T, d].
    q4 = q2.reshape(B, Tq, n_heads, d_k).transpose(0, 2, 1, 3)
    k4 = k2.reshape(B, Tk, n_heads, d_k).transpose(0, 2, 1, 3)
    v4 = v2.reshape(B, Tk, n_heads, d_v).transpose(0, 2, 1, 3)
    mask_b = mask.astype(_MXU_DTYPE)                 # [B, Tq, Tk], no head bcast

    ctx4 = flash_attention(q4, k4, v4, mask_b)        # [B, H, Tq, dv] bf16
    ctx2 = ctx4.transpose(0, 2, 1, 3).reshape(B * Tq, Hdv)

    # Fused output projection + residual + LayerNorm (f32 residual stream).
    out = proj_residual_layernorm(ctx2, p["wo"], p["bo"], xq2,
                                  p["ln_g"], p["ln_b"])
    return out.reshape(B, Tq, D)


def decoder_layer(p, dec_input, enc_output, enc_mask, dec_mask, n_heads, d_k, d_v):
    x = multi_head_attention(p["self_attn"], dec_input, dec_input, dec_mask,
                             n_heads, d_k, d_v, is_self=True)
    x = multi_head_attention(p["cross_attn"], x, enc_output, enc_mask,
                             n_heads, d_k, d_v, is_self=False)
    x = ffn_block(p["ffn"], x)
    return x


def decoder_forward(params, dec_input, enc_output, enc_mask, dec_mask,
                    n_heads, d_k, d_v):
    # Faithful to the reference: every layer consumes dec_input (not x).
    x = None
    for layer_p in params["layers"]:
        x = decoder_layer(layer_p, dec_input, enc_output, enc_mask, dec_mask,
                          n_heads, d_k, d_v)
    B, T, D = x.shape
    logits = linear(x.reshape(B * T, D), params["w_out"], params["b_out"])
    return logits.reshape(B, T, -1)


# ----------------------------- Demo ------------------------------------------

if __name__ == "__main__":
    dec_vocab_size = 50
    d_model, d_k, d_v, d_ffn = 32, 8, 8, 64
    n_heads, n_layers = 4, 2
    B, Tq, Tk = 2, 8, 8

    root = jax.random.PRNGKey(0)
    k_params, k_dec, k_enc = jax.random.split(root, 3)

    params = init_decoder_params(k_params, dec_vocab_size, d_model, d_k, d_v,
                                 d_ffn, n_heads, n_layers)

    dec_input = jax.random.normal(k_dec, (B, Tq, d_model), jnp.float32)
    enc_output = jax.random.normal(k_enc, (B, Tk, d_model), jnp.float32)
    # dec_mask: causal (lower-triangular) self-attention mask; enc_mask: all valid.
    dec_mask = jnp.broadcast_to(jnp.tril(jnp.ones((Tq, Tq), jnp.float32)),
                                (B, Tq, Tq))
    enc_mask = jnp.ones((B, Tq, Tk), jnp.float32)

    fwd = jax.jit(functools.partial(decoder_forward,
                                    n_heads=n_heads, d_k=d_k, d_v=d_v))
    logits = fwd(params, dec_input, enc_output, enc_mask, dec_mask)
    logits = jax.block_until_ready(logits)

    assert logits.shape == (B, Tq, dec_vocab_size)
    assert bool(jnp.all(jnp.isfinite(logits)))
    print("KERNEL_OK")
</pallas_src>

<mosaic_0001>
module attributes {stable_mosaic.version = 11 : i64} {
  func.func @_linear_kernel(%arg0: i32, %arg1: i32, %arg2: i32, %arg3: memref<16x32xf32, #tpu.memory_space<vmem>>, %arg4: memref<32x96xbf16, #tpu.memory_space<vmem>>, %arg5: memref<1x96xf32, #tpu.memory_space<vmem>>, %arg6: memref<16x96xbf16, #tpu.memory_space<vmem>>, %arg7: memref<16x96xf32, #tpu.memory_space<vmem>>) attributes {dimension_semantics = [#tpu.dimension_semantics<parallel>, #tpu.dimension_semantics<parallel>, #tpu.dimension_semantics<arbitrary>], iteration_bounds = array<i64: 1, 1, 1>, scalar_prefetch = 0 : i64, scratch_operands = 1 : i64, tpu.core_type = #tpu.core_type<tc>, window_params = [{transform_indices = @transform_0, window_bounds = array<i64: 16, 32>}, {transform_indices = @transform_1, window_bounds = array<i64: 32, 96>}, {transform_indices = @transform_2, window_bounds = array<i64: 1, 96>}, {transform_indices = @transform_3, window_bounds = array<i64: 16, 96>}]} {
    %c0_i32 = arith.constant 0 : i32
    %0 = arith.cmpi eq, %arg2, %c0_i32 : i32
    %1 = arith.extui %0 : i1 to i32
    %c0_i32_0 = arith.constant 0 : i32
    %2 = arith.cmpi ne, %1, %c0_i32_0 : i32
    scf.if %2 {
      %cst_10 = arith.constant 0.000000e+00 : f32
      %13 = vector.broadcast %cst_10 : f32 to vector<16x96xf32>
      %c0_11 = arith.constant 0 : index
      %c0_12 = arith.constant 0 : index
      %14 = vector.load %arg7[%c0_11, %c0_12] : memref<16x96xf32, #tpu.memory_space<vmem>>, vector<16x96xf32>
      tpu.vector_store %arg7[%c0_11, %c0_12], %13 {strides = array<i32>} : memref<16x96xf32, #tpu.memory_space<vmem>>, vector<16x96xf32>,
    } else {
    }
    %c0 = arith.constant 0 : index
    %c0_1 = arith.constant 0 : index
    %3 = vector.load %arg7[%c0, %c0_1] : memref<16x96xf32, #tpu.memory_space<vmem>>, vector<16x96xf32>
    %c0_2 = arith.constant 0 : index
    %c0_3 = arith.constant 0 : index
    %4 = vector.load %arg3[%c0_2, %c0_3] : memref<16x32xf32, #tpu.memory_space<vmem>>, vector<16x32xf32>
    %5 = arith.truncf %4 : vector<16x32xf32> to vector<16x32xbf16>
    %c0_4 = arith.constant 0 : index
    %c0_5 = arith.constant 0 : index
    %6 = vector.load %arg4[%c0_4, %c0_5] : memref<32x96xbf16, #tpu.memory_space<vmem>>, vector<32x96xbf16>
    %cst = arith.constant dense<0.000000e+00> : vector<16x96xf32>
    %7 = tpu.matmul %5, %6, %cst {dimension_numbers = #tpu.dot_dimension_numbers<[1], [0], [0], [1], [0, 0, 1, 1], [], []>} : vector<16x32xbf16>, vector<32x96xbf16>, vector<16x96xf32> -> vector<16x96xf32>
    %8 = arith.addf %3, %7 : vector<16x96xf32>
    %c0_6 = arith.constant 0 : index
    %c0_7 = arith.constant 0 : index
    %9 = vector.load %arg7[%c0_6, %c0_7] : memref<16x96xf32, #tpu.memory_space<vmem>>, vector<16x96xf32>
    tpu.vector_store %arg7[%c0_6, %c0_7], %8 {strides = array<i32>} : memref<16x96xf32, #tpu.memory_space<vmem>>, vector<16x96xf32>,
    %c0_i32_8 = arith.constant 0 : i32
    %10 = arith.cmpi eq, %arg2, %c0_i32_8 : i32
    %11 = arith.extui %10 : i1 to i32
    %c0_i32_9 = arith.constant 0 : i32
    %12 = arith.cmpi ne, %11, %c0_i32_9 : i32
    scf.if %12 {
      %c0_10 = arith.constant 0 : index
      %c0_11 = arith.constant 0 : index
      %13 = vector.load %arg7[%c0_10, %c0_11] : memref<16x96xf32, #tpu.memory_space<vmem>>, vector<16x96xf32>
      %c0_12 = arith.constant 0 : index
      %c0_13 = arith.constant 0 : index
      %14 = vector.load %arg5[%c0_12, %c0_13] : memref<1x96xf32, #tpu.memory_space<vmem>>, vector<1x96xf32>
      %15 = vector.broadcast %14 : vector<1x96xf32> to vector<16x96xf32>
      %16 = arith.addf %13, %15 : vector<16x96xf32>
      %17 = arith.truncf %16 : vector<16x96xf32> to vector<16x96xbf16>
      %c0_14 = arith.constant 0 : index
      %c0_15 = arith.constant 0 : index
      %18 = vector.load %arg6[%c0_14, %c0_15] : memref<16x96xbf16, #tpu.memory_space<vmem>>, vector<16x96xbf16>
      tpu.vector_store %arg6[%c0_14, %c0_15], %17 {strides = array<i32>} : memref<16x96xbf16, #tpu.memory_space<vmem>>, vector<16x96xbf16>,
    } else {
    }
    return
  }
  func.func @transform_0(%arg0: i32, %arg1: i32, %arg2: i32) -> (i32, i32) {
    %c0_i32 = arith.constant 0 : i32
    return %arg0, %arg2 : i32, i32
  }
  func.func @transform_1(%arg0: i32, %arg1: i32, %arg2: i32) -> (i32, i32) {
    %c0_i32 = arith.constant 0 : i32
    return %arg2, %arg1 : i32, i32
  }
  func.func @transform_2(%arg0: i32, %arg1: i32, %arg2: i32) -> (i32, i32) {
    %c0_i32 = arith.constant 0 : i32
    %c0_i32_0 = arith.constant 0 : i32
    return %c0_i32, %arg1 : i32, i32
  }
  func.func @transform_3(%arg0: i32, %arg1: i32, %arg2: i32) -> (i32, i32) {
    %c0_i32 = arith.constant 0 : i32
    return %arg0, %arg1 : i32, i32
  }
}

module attributes {stable_mosaic.version = 11 : i64} {
  func.func @_flash_attn_kernel(%arg0: i32, %arg1: i32, %arg2: i32, %arg3: memref<1x4x8x8xbf16, #tpu.memory_space<vmem>>, %arg4: memref<1x4x8x8xbf16, #tpu.memory_space<vmem>>, %arg5: memref<1x4x8x8xbf16, #tpu.memory_space<vmem>>, %arg6: memref<1x8x8xbf16, #tpu.memory_space<vmem>>, %arg7: memref<1x4x8x8xbf16, #tpu.memory_space<vmem>>, %arg8: memref<4x8x1xf32, #tpu.memory_space<vmem>>, %arg9: memref<4x8x1xf32, #tpu.memory_space<vmem>>, %arg10: memref<4x8x8xf32, #tpu.memory_space<vmem>>) attributes {dimension_semantics = [#tpu.dimension_semantics<parallel>, #tpu.dimension_semantics<parallel>, #tpu.dimension_semantics<arbitrary>], iteration_bounds = array<i64: 2, 1, 1>, scalar_prefetch = 0 : i64, scratch_operands = 3 : i64, tpu.core_type = #tpu.core_type<tc>, window_params = [{transform_indices = @transform_0, window_bounds = array<i64: 1, 4, 8, 8>}, {transform_indices = @transform_1, window_bounds = array<i64: 1, 4, 8, 8>}, {transform_indices = @transform_2, window_bounds = array<i64: 1, 4, 8, 8>}, {transform_indices = @transform_3, window_bounds = array<i64: 1, 8, 8>}, {transform_indices = @transform_4, window_bounds = array<i64: 1, 4, 8, 8>}]} {
    %c0_i32 = arith.constant 0 : i32
    %0 = arith.cmpi eq, %arg2, %c0_i32 : i32
    %1 = arith.extui %0 : i1 to i32
    %c0_i32_0 = arith.constant 0 : i32
    %2 = arith.cmpi ne, %1, %c0_i32_0 : i32
    scf.if %2 {
      %cst_41 = arith.constant 0xFF800000 : f32
      %48 = vector.broadcast %cst_41 : f32 to vector<4x8x1xf32>
      %c0_42 = arith.constant 0 : index
      %c0_43 = arith.constant 0 : index
      %c0_44 = arith.constant 0 : index
      %49 = vector.load %arg8[%c0_42, %c0_43, %c0_44] : memref<4x8x1xf32, #tpu.memory_space<vmem>>, vector<4x8x1xf32>
      tpu.vector_store %arg8[%c0_42, %c0_43, %c0_44], %48 {strides = array<i32>} : memref<4x8x1xf32, #tpu.memory_space<vmem>>, vector<4x8x1xf32>,
      %cst_45 = arith.constant 0.000000e+00 : f32
      %50 = vector.broadcast %cst_45 : f32 to vector<4x8x1xf32>
      %c0_46 = arith.constant 0 : index
      %c0_47 = arith.constant 0 : index
      %c0_48 = arith.constant 0 : index
      %51 = vector.load %arg9[%c0_46, %c0_47, %c0_48] : memref<4x8x1xf32, #tpu.memory_space<vmem>>, vector<4x8x1xf32>
      tpu.vector_store %arg9[%c0_46, %c0_47, %c0_48], %50 {strides = array<i32>} : memref<4x8x1xf32, #tpu.memory_space<vmem>>, vector<4x8x1xf32>,
      %cst_49 = arith.constant 0.000000e+00 : f32
      %52 = vector.broadcast %cst_49 : f32 to vector<4x8x8xf32>
      %c0_50 = arith.constant 0 : index
      %c0_51 = arith.constant 0 : index
      %c0_52 = arith.constant 0 : index
      %53 = vector.load %arg10[%c0_50, %c0_51, %c0_52] : memref<4x8x8xf32, #tpu.memory_space<vmem>>, vector<4x8x8xf32>
      tpu.vector_store %arg10[%c0_50, %c0_51, %c0_52], %52 {strides = array<i32>} : memref<4x8x8xf32, #tpu.memory_space<vmem>>, vector<4x8x8xf32>,
    } else {
    }
    %c0 = arith.constant 0 : index
    %c0_1 = arith.constant 0 : index
    %c0_2 = arith.constant 0 : index
    %c0_3 = arith.constant 0 : index
    %3 = vector.load %arg3[%c0, %c0_1, %c0_2, %c0_3] : memref<1x4x8x8xbf16, #tpu.memory_space<vmem>>, vector<1x4x8x8xbf16>
    %4 = vector.shape_cast %3 : vector<1x4x8x8xbf16> to vector<4x8x8xbf16>
    %c0_4 = arith.constant 0 : index
    %c0_5 = arith.constant 0 : index
    %c0_6 = arith.constant 0 : index
    %c0_7 = arith.constant 0 : index
    %5 = vector.load %arg4[%c0_4, %c0_5, %c0_6, %c0_7] : memref<1x4x8x8xbf16, #tpu.memory_space<vmem>>, vector<1x4x8x8xbf16>
    %6 = vector.shape_cast %5 : vector<1x4x8x8xbf16> to vector<4x8x8xbf16>
    %c0_8 = arith.constant 0 : index
    %c0_9 = arith.constant 0 : index
    %c0_10 = arith.constant 0 : index
    %c0_11 = arith.constant 0 : index
    %7 = vector.load %arg5[%c0_8, %c0_9, %c0_10, %c0_11] : memref<1x4x8x8xbf16, #tpu.memory_space<vmem>>, vector<1x4x8x8xbf16>
    %8 = vector.shape_cast %7 : vector<1x4x8x8xbf16> to vector<4x8x8xbf16>
    "tpu.trace_start"() <{level = 10 : i32, message = "hqd,hkd->hqk"}> : () -> ()
    %cst = arith.constant dense<0.000000e+00> : vector<4x8x8xf32>
    %9 = tpu.matmul %4, %6, %cst {dimension_numbers = #tpu.dot_dimension_numbers<[2], [2], [1], [1], [0, 0, 0, 1, 1, 1], [0], [0]>} : vector<4x8x8xbf16>, vector<4x8x8xbf16>, vector<4x8x8xf32> -> vector<4x8x8xf32>
    "tpu.trace_stop"() : () -> ()
    %cst_12 = arith.constant 0.353553385 : f32
    %10 = vector.broadcast %cst_12 : f32 to vector<4x8x8xf32>
    %11 = arith.mulf %9, %10 : vector<4x8x8xf32>
    %c0_13 = arith.constant 0 : index
    %c0_14 = arith.constant 0 : index
    %c0_15 = arith.constant 0 : index
    %12 = vector.load %arg6[%c0_13, %c0_14, %c0_15] : memref<1x8x8xbf16, #tpu.memory_space<vmem>>, vector<1x8x8xbf16>
    %13 = vector.shape_cast %12 : vector<1x8x8xbf16> to vector<8x8xbf16>
    %14 = arith.extf %13 : vector<8x8xbf16> to vector<8x8xf32>
    %cst_16 = arith.constant 1.000000e+00 : f32
    %15 = vector.broadcast %cst_16 : f32 to vector<8x8xf32>
    %16 = arith.subf %15, %14 : vector<8x8xf32>
    %cst_17 = arith.constant -1.000000e+09 : f32
    %17 = vector.broadcast %cst_17 : f32 to vector<8x8xf32>
    %18 = arith.mulf %16, %17 : vector<8x8xf32>
    %19 = vector.shape_cast %18 : vector<8x8xf32> to vector<1x8x8xf32>
    %20 = vector.broadcast %19 : vector<1x8x8xf32> to vector<4x8x8xf32>
    %21 = arith.addf %11, %20 : vector<4x8x8xf32>
    %c0_18 = arith.constant 0 : index
    %c0_19 = arith.constant 0 : index
    %c0_20 = arith.constant 0 : index
    %22 = vector.load %arg8[%c0_18, %c0_19, %c0_20] : memref<4x8x1xf32, #tpu.memory_space<vmem>>, vector<4x8x1xf32>
    %cst_21 = arith.constant dense<0xFF800000> : vector<4x8xf32>
    %23 = vector.multi_reduction <maximumf>, %21, %cst_21 [2] : vector<4x8x8xf32> to vector<4x8xf32>
    %24 = vector.shape_cast %23 : vector<4x8xf32> to vector<4x8x1xf32>
    %25 = arith.maximumf %22, %24 : vector<4x8x1xf32>
    %26 = arith.subf %22, %25 : vector<4x8x1xf32>
    %27 = math.exp %26 : vector<4x8x1xf32>
    %28 = vector.broadcast %25 : vector<4x8x1xf32> to vector<4x8x8xf32>
    %29 = arith.subf %21, %28 : vector<4x8x8xf32>
    %30 = math.exp %29 : vector<4x8x8xf32>
    %c0_22 = arith.constant 0 : index
    %c0_23 = arith.constant 0 : index
    %c0_24 = arith.constant 0 : index
    %31 = vector.load %arg9[%c0_22, %c0_23, %c0_24] : memref<4x8x1xf32, #tpu.memory_space<vmem>>, vector<4x8x1xf32>
    %32 = arith.mulf %27, %31 : vector<4x8x1xf32>
    %cst_25 = arith.constant dense<0.000000e+00> : vector<4x8xf32>
    %33 = vector.multi_reduction <add>, %30, %cst_25 [2] : vector<4x8x8xf32> to vector<4x8xf32>
    %34 = vector.shape_cast %33 : vector<4x8xf32> to vector<4x8x1xf32>
    %35 = arith.addf %32, %34 : vector<4x8x1xf32>
    %c0_26 = arith.constant 0 : index
    %c0_27 = arith.constant 0 : index
    %c0_28 = arith.constant 0 : index
    %36 = vector.load %arg9[%c0_26, %c0_27, %c0_28] : memref<4x8x1xf32, #tpu.memory_space<vmem>>, vector<4x8x1xf32>
    tpu.vector_store %arg9[%c0_26, %c0_27, %c0_28], %35 {strides = array<i32>} : memref<4x8x1xf32, #tpu.memory_space<vmem>>, vector<4x8x1xf32>,
    %c0_29 = arith.constant 0 : index
    %c0_30 = arith.constant 0 : index
    %c0_31 = arith.constant 0 : index
    %37 = vector.load %arg10[%c0_29, %c0_30, %c0_31] : memref<4x8x8xf32, #tpu.memory_space<vmem>>, vector<4x8x8xf32>
    %38 = vector.broadcast %27 : vector<4x8x1xf32> to vector<4x8x8xf32>
    %39 = arith.mulf %38, %37 : vector<4x8x8xf32>
    %40 = arith.truncf %30 : vector<4x8x8xf32> to vector<4x8x8xbf16>
    "tpu.trace_start"() <{level = 10 : i32, message = "hqk,hkd->hqd"}> : () -> ()
    %cst_32 = arith.constant dense<0.000000e+00> : vector<4x8x8xf32>
    %41 = tpu.matmul %40, %8, %cst_32 {dimension_numbers = #tpu.dot_dimension_numbers<[2], [1], [1], [2], [0, 0, 0, 1, 1, 2], [0], [0]>} : vector<4x8x8xbf16>, vector<4x8x8xbf16>, vector<4x8x8xf32> -> vector<4x8x8xf32>
    "tpu.trace_stop"() : () -> ()
    %42 = arith.addf %39, %41 : vector<4x8x8xf32>
    %c0_33 = arith.constant 0 : index
    %c0_34 = arith.constant 0 : index
    %c0_35 = arith.constant 0 : index
    %43 = vector.load %arg10[%c0_33, %c0_34, %c0_35] : memref<4x8x8xf32, #tpu.memory_space<vmem>>, vector<4x8x8xf32>
    tpu.vector_store %arg10[%c0_33, %c0_34, %c0_35], %42 {strides = array<i32>} : memref<4x8x8xf32, #tpu.memory_space<vmem>>, vector<4x8x8xf32>,
    %c0_36 = arith.constant 0 : index
    %c0_37 = arith.constant 0 : index
    %c0_38 = arith.constant 0 : index
    %44 = vector.load %arg8[%c0_36, %c0_37, %c0_38] : memref<4x8x1xf32, #tpu.memory_space<vmem>>, vector<4x8x1xf32>
    tpu.vector_store %arg8[%c0_36, %c0_37, %c0_38], %25 {strides = array<i32>} : memref<4x8x1xf32, #tpu.memory_space<vmem>>, vector<4x8x1xf32>,
    %c0_i32_39 = arith.constant 0 : i32
    %45 = arith.cmpi eq, %arg2, %c0_i32_39 : i32
    %46 = arith.extui %45 : i1 to i32
    %c0_i32_40 = arith.constant 0 : i32
    %47 = arith.cmpi ne, %46, %c0_i32_40 : i32
    scf.if %47 {
      %c0_41 = arith.constant 0 : index
      %c0_42 = arith.constant 0 : index
      %c0_43 = arith.constant 0 : index
      %48 = vector.load %arg9[%c0_41, %c0_42, %c0_43] : memref<4x8x1xf32, #tpu.memory_space<vmem>>, vector<4x8x1xf32>
      %49 = tpu.reciprocal %48 {approx = true} : vector<4x8x1xf32> -> vector<4x8x1xf32>
      %c0_44 = arith.constant 0 : index
      %c0_45 = arith.constant 0 : index
      %c0_46 = arith.constant 0 : index
      %50 = vector.load %arg10[%c0_44, %c0_45, %c0_46] : memref<4x8x8xf32, #tpu.memory_space<vmem>>, vector<4x8x8xf32>
      %51 = vector.broadcast %49 : vector<4x8x1xf32> to vector<4x8x8xf32>
      %52 = arith.mulf %50, %51 : vector<4x8x8xf32>
      %53 = arith.truncf %52 : vector<4x8x8xf32> to vector<4x8x8xbf16>
      %c0_47 = arith.constant 0 : index
      %c0_48 = arith.constant 0 : index
      %c0_49 = arith.constant 0 : index
      %c0_50 = arith.constant 0 : index
      %54 = vector.load %arg7[%c0_47, %c0_48, %c0_49, %c0_50] : memref<1x4x8x8xbf16, #tpu.memory_space<vmem>>, vector<1x4x8x8xbf16>
      %55 = vector.shape_cast %54 : vector<1x4x8x8xbf16> to vector<4x8x8xbf16>
      %56 = vector.shape_cast %53 : vector<4x8x8xbf16> to vector<1x4x8x8xbf16>
      tpu.vector_store %arg7[%c0_47, %c0_48, %c0_49, %c0_50], %56 {strides = array<i32>} : memref<1x4x8x8xbf16, #tpu.memory_space<vmem>>, vector<1x4x8x8xbf16>,
    } else {
    }
    return
  }
  func.func @transform_0(%arg0: i32, %arg1: i32, %arg2: i32) -> (i32, i32, i32, i32) {
    %c0_i32 = arith.constant 0 : i32
    %c0_i32_0 = arith.constant 0 : i32
    %c0_i32_1 = arith.constant 0 : i32
    return %arg0, %c0_i32, %arg1, %c0_i32_0 : i32, i32, i32, i32
  }
  func.func @transform_1(%arg0: i32, %arg1: i32, %arg2: i32) -> (i32, i32, i32, i32) {
    %c0_i32 = arith.constant 0 : i32
    %c0_i32_0 = arith.constant 0 : i32
    %c0_i32_1 = arith.constant 0 : i32
    return %arg0, %c0_i32, %arg2, %c0_i32_0 : i32, i32, i32, i32
  }
  func.func @transform_2(%arg0: i32, %arg1: i32, %arg2: i32) -> (i32, i32, i32, i32) {
    %c0_i32 = arith.constant 0 : i32
    %c0_i32_0 = arith.constant 0 : i32
    %c0_i32_1 = arith.constant 0 : i32
    return %arg0, %c0_i32, %arg2, %c0_i32_0 : i32, i32, i32, i32
  }
  func.func @transform_3(%arg0: i32, %arg1: i32, %arg2: i32) -> (i32, i32, i32) {
    %c0_i32 = arith.constant 0 : i32
    return %arg0, %arg1, %arg2 : i32, i32, i32
  }
  func.func @transform_4(%arg0: i32, %arg1: i32, %arg2: i32) -> (i32, i32, i32, i32) {
    %c0_i32 = arith.constant 0 : i32
    %c0_i32_0 = arith.constant 0 : i32
    %c0_i32_1 = arith.constant 0 : i32
    return %arg0, %c0_i32, %arg1, %c0_i32_0 : i32, i32, i32, i32
  }
}

module attributes {stable_mosaic.version = 11 : i64} {
  func.func @_proj_res_ln_kernel(%arg0: i32, %arg1: memref<16x32xbf16, #tpu.memory_space<vmem>>, %arg2: memref<32x32xbf16, #tpu.memory_space<vmem>>, %arg3: memref<1x32xf32, #tpu.memory_space<vmem>>, %arg4: memref<16x32xf32, #tpu.memory_space<vmem>>, %arg5: memref<1x32xf32, #tpu.memory_space<vmem>>, %arg6: memref<1x32xf32, #tpu.memory_space<vmem>>, %arg7: memref<16x32xf32, #tpu.memory_space<vmem>>) attributes {dimension_semantics = [#tpu.dimension_semantics<parallel>], iteration_bounds = array<i64: 1>, scalar_prefetch = 0 : i64, scratch_operands = 0 : i64, tpu.core_type = #tpu.core_type<tc>, window_params = [{transform_indices = @transform_0, window_bounds = array<i64: 16, 32>}, {pipeline_mode = #tpu.pipeline_mode<synchronous>, transform_indices = @transform_1, window_bounds = array<i64: 32, 32>}, {pipeline_mode = #tpu.pipeline_mode<synchronous>, transform_indices = @transform_2, window_bounds = array<i64: 1, 32>}, {transform_indices = @transform_3, window_bounds = array<i64: 16, 32>}, {pipeline_mode = #tpu.pipeline_mode<synchronous>, transform_indices = @transform_4, window_bounds = array<i64: 1, 32>}, {pipeline_mode = #tpu.pipeline_mode<synchronous>, transform_indices = @transform_5, window_bounds = array<i64: 1, 32>}, {transform_indices = @transform_6, window_bounds = array<i64: 16, 32>}]} {
    %c0 = arith.constant 0 : index
    %c0_0 = arith.constant 0 : index
    %0 = vector.load %arg1[%c0, %c0_0] : memref<16x32xbf16, #tpu.memory_space<vmem>>, vector<16x32xbf16>
    %c0_1 = arith.constant 0 : index
    %c0_2 = arith.constant 0 : index
    %1 = vector.load %arg2[%c0_1, %c0_2] : memref<32x32xbf16, #tpu.memory_space<vmem>>, vector<32x32xbf16>
    %cst = arith.constant dense<0.000000e+00> : vector<16x32xf32>
    %2 = tpu.matmul %0, %1, %cst {dimension_numbers = #tpu.dot_dimension_numbers<[1], [0], [0], [1], [0, 0, 1, 1], [], []>} : vector<16x32xbf16>, vector<32x32xbf16>, vector<16x32xf32> -> vector<16x32xf32>
    %c0_3 = arith.constant 0 : index
    %c0_4 = arith.constant 0 : index
    %3 = vector.load %arg3[%c0_3, %c0_4] : memref<1x32xf32, #tpu.memory_space<vmem>>, vector<1x32xf32>
    %4 = vector.broadcast %3 : vector<1x32xf32> to vector<16x32xf32>
    %5 = arith.addf %2, %4 : vector<16x32xf32>
    %c0_5 = arith.constant 0 : index
    %c0_6 = arith.constant 0 : index
    %6 = vector.load %arg4[%c0_5, %c0_6] : memref<16x32xf32, #tpu.memory_space<vmem>>, vector<16x32xf32>
    %7 = arith.addf %5, %6 : vector<16x32xf32>
    %cst_7 = arith.constant dense<0.000000e+00> : vector<16xf32>
    %8 = vector.multi_reduction <add>, %7, %cst_7 [1] : vector<16x32xf32> to vector<16xf32>
    %9 = vector.shape_cast %8 : vector<16xf32> to vector<16x1xf32>
    %cst_8 = arith.constant 3.200000e+01 : f32
    %10 = vector.broadcast %cst_8 : f32 to vector<16x1xf32>
    %11 = arith.divf %9, %10 : vector<16x1xf32>
    %12 = vector.broadcast %11 : vector<16x1xf32> to vector<16x32xf32>
    %13 = arith.subf %7, %12 : vector<16x32xf32>
    %14 = arith.mulf %13, %13 : vector<16x32xf32>
    %cst_9 = arith.constant dense<0.000000e+00> : vector<16xf32>
    %15 = vector.multi_reduction <add>, %14, %cst_9 [1] : vector<16x32xf32> to vector<16xf32>
    %16 = vector.shape_cast %15 : vector<16xf32> to vector<16x1xf32>
    %cst_10 = arith.constant 3.200000e+01 : f32
    %17 = vector.broadcast %cst_10 : f32 to vector<16x1xf32>
    %18 = arith.divf %16, %17 : vector<16x1xf32>
    %cst_11 = arith.constant 9.99999974E-6 : f32
    %19 = vector.broadcast %cst_11 : f32 to vector<16x1xf32>
    %20 = arith.addf %18, %19 : vector<16x1xf32>
    %21 = math.rsqrt %20 : vector<16x1xf32>
    %22 = vector.broadcast %21 : vector<16x1xf32> to vector<16x32xf32>
    %23 = arith.mulf %13, %22 : vector<16x32xf32>
    %c0_12 = arith.constant 0 : index
    %c0_13 = arith.constant 0 : index
    %24 = vector.load %arg5[%c0_12, %c0_13] : memref<1x32xf32, #tpu.memory_space<vmem>>, vector<1x32xf32>
    %25 = vector.broadcast %24 : vector<1x32xf32> to vector<16x32xf32>
    %26 = arith.mulf %23, %25 : vector<16x32xf32>
    %c0_14 = arith.constant 0 : index
    %c0_15 = arith.constant 0 : index
    %27 = vector.load %arg6[%c0_14, %c0_15] : memref<1x32xf32, #tpu.memory_space<vmem>>, vector<1x32xf32>
    %28 = vector.broadcast %27 : vector<1x32xf32> to vector<16x32xf32>
    %29 = arith.addf %26, %28 : vector<16x32xf32>
    %c0_16 = arith.constant 0 : index
    %c0_17 = arith.constant 0 : index
    %30 = vector.load %arg7[%c0_16, %c0_17] : memref<16x32xf32, #tpu.memory_space<vmem>>, vector<16x32xf32>
    tpu.vector_store %arg7[%c0_16, %c0_17], %29 {strides = array<i32>} : memref<16x32xf32, #tpu.memory_space<vmem>>, vector<16x32xf32>,
    return
  }
  func.func @transform_0(%arg0: i32) -> (i32, i32) {
    %c0_i32 = arith.constant 0 : i32
    %c0_i32_0 = arith.constant 0 : i32
    return %arg0, %c0_i32 : i32, i32
  }
  func.func @transform_1(%arg0: i32) -> (i32, i32) {
    %c0_i32 = arith.constant 0 : i32
    %c0_i32_0 = arith.constant 0 : i32
    %c0_i32_1 = arith.constant 0 : i32
    return %c0_i32, %c0_i32_0 : i32, i32
  }
  func.func @transform_2(%arg0: i32) -> (i32, i32) {
    %c0_i32 = arith.constant 0 : i32
    %c0_i32_0 = arith.constant 0 : i32
    %c0_i32_1 = arith.constant 0 : i32
    return %c0_i32, %c0_i32_0 : i32, i32
  }
  func.func @transform_3(%arg0: i32) -> (i32, i32) {
    %c0_i32 = arith.constant 0 : i32
    %c0_i32_0 = arith.constant 0 : i32
    return %arg0, %c0_i32 : i32, i32
  }
  func.func @transform_4(%arg0: i32) -> (i32, i32) {
    %c0_i32 = arith.constant 0 : i32
    %c0_i32_0 = arith.constant 0 : i32
    %c0_i32_1 = arith.constant 0 : i32
    return %c0_i32, %c0_i32_0 : i32, i32
  }
  func.func @transform_5(%arg0: i32) -> (i32, i32) {
    %c0_i32 = arith.constant 0 : i32
    %c0_i32_0 = arith.constant 0 : i32
    %c0_i32_1 = arith.constant 0 : i32
    return %c0_i32, %c0_i32_0 : i32, i32
  }
  func.func @transform_6(%arg0: i32) -> (i32, i32) {
    %c0_i32 = arith.constant 0 : i32
    %c0_i32_0 = arith.constant 0 : i32
    return %arg0, %c0_i32 : i32, i32
  }
}

module attributes {stable_mosaic.version = 11 : i64} {
  func.func @_linear_kernel(%arg0: i32, %arg1: i32, %arg2: i32, %arg3: memref<16x32xf32, #tpu.memory_space<vmem>>, %arg4: memref<32x32xbf16, #tpu.memory_space<vmem>>, %arg5: memref<1x32xf32, #tpu.memory_space<vmem>>, %arg6: memref<16x32xbf16, #tpu.memory_space<vmem>>, %arg7: memref<16x32xf32, #tpu.memory_space<vmem>>) attributes {dimension_semantics = [#tpu.dimension_semantics<parallel>, #tpu.dimension_semantics<parallel>, #tpu.dimension_semantics<arbitrary>], iteration_bounds = array<i64: 1, 1, 1>, scalar_prefetch = 0 : i64, scratch_operands = 1 : i64, tpu.core_type = #tpu.core_type<tc>, window_params = [{transform_indices = @transform_0, window_bounds = array<i64: 16, 32>}, {transform_indices = @transform_1, window_bounds = array<i64: 32, 32>}, {transform_indices = @transform_2, window_bounds = array<i64: 1, 32>}, {transform_indices = @transform_3, window_bounds = array<i64: 16, 32>}]} {
    %c0_i32 = arith.constant 0 : i32
    %0 = arith.cmpi eq, %arg2, %c0_i32 : i32
    %1 = arith.extui %0 : i1 to i32
    %c0_i32_0 = arith.constant 0 : i32
    %2 = arith.cmpi ne, %1, %c0_i32_0 : i32
    scf.if %2 {
      %cst_10 = arith.constant 0.000000e+00 : f32
      %13 = vector.broadcast %cst_10 : f32 to vector<16x32xf32>
      %c0_11 = arith.constant 0 : index
      %c0_12 = arith.constant 0 : index
      %14 = vector.load %arg7[%c0_11, %c0_12] : memref<16x32xf32, #tpu.memory_space<vmem>>, vector<16x32xf32>
      tpu.vector_store %arg7[%c0_11, %c0_12], %13 {strides = array<i32>} : memref<16x32xf32, #tpu.memory_space<vmem>>, vector<16x32xf32>,
    } else {
    }
    %c0 = arith.constant 0 : index
    %c0_1 = arith.constant 0 : index
    %3 = vector.load %arg7[%c0, %c0_1] : memref<16x32xf32, #tpu.memory_space<vmem>>, vector<16x32xf32>
    %c0_2 = arith.constant 0 : index
    %c0_3 = arith.constant 0 : index
    %4 = vector.load %arg3[%c0_2, %c0_3] : memref<16x32xf32, #tpu.memory_space<vmem>>, vector<16x32xf32>
    %5 = arith.truncf %4 : vector<16x32xf32> to vector<16x32xbf16>
    %c0_4 = arith.constant 0 : index
    %c0_5 = arith.constant 0 : index
    %6 = vector.load %arg4[%c0_4, %c0_5] : memref<32x32xbf16, #tpu.memory_space<vmem>>, vector<32x32xbf16>
    %cst = arith.constant dense<0.000000e+00> : vector<16x32xf32>
    %7 = tpu.matmul %5, %6, %cst {dimension_numbers = #tpu.dot_dimension_numbers<[1], [0], [0], [1], [0, 0, 1, 1], [], []>} : vector<16x32xbf16>, vector<32x32xbf16>, vector<16x32xf32> -> vector<16x32xf32>
    %8 = arith.addf %3, %7 : vector<16x32xf32>
    %c0_6 = arith.constant 0 : index
    %c0_7 = arith.constant 0 : index
    %9 = vector.load %arg7[%c0_6, %c0_7] : memref<16x32xf32, #tpu.memory_space<vmem>>, vector<16x32xf32>
    tpu.vector_store %arg7[%c0_6, %c0_7], %8 {strides = array<i32>} : memref<16x32xf32, #tpu.memory_space<vmem>>, vector<16x32xf32>,
    %c0_i32_8 = arith.constant 0 : i32
    %10 = arith.cmpi eq, %arg2, %c0_i32_8 : i32
    %11 = arith.extui %10 : i1 to i32
    %c0_i32_9 = arith.constant 0 : i32
    %12 = arith.cmpi ne, %11, %c0_i32_9 : i32
    scf.if %12 {
      %c0_10 = arith.constant 0 : index
      %c0_11 = arith.constant 0 : index
      %13 = vector.load %arg7[%c0_10, %c0_11] : memref<16x32xf32, #tpu.memory_space<vmem>>, vector<16x32xf32>
      %c0_12 = arith.constant 0 : index
      %c0_13 = arith.constant 0 : index
      %14 = vector.load %arg5[%c0_12, %c0_13] : memref<1x32xf32, #tpu.memory_space<vmem>>, vector<1x32xf32>
      %15 = vector.broadcast %14 : vector<1x32xf32> to vector<16x32xf32>
      %16 = arith.addf %13, %15 : vector<16x32xf32>
      %17 = arith.truncf %16 : vector<16x32xf32> to vector<16x32xbf16>
      %c0_14 = arith.constant 0 : index
      %c0_15 = arith.constant 0 : index
      %18 = vector.load %arg6[%c0_14, %c0_15] : memref<16x32xbf16, #tpu.memory_space<vmem>>, vector<16x32xbf16>
      tpu.vector_store %arg6[%c0_14, %c0_15], %17 {strides = array<i32>} : memref<16x32xbf16, #tpu.memory_space<vmem>>, vector<16x32xbf16>,
    } else {
    }
    return
  }
  func.func @transform_0(%arg0: i32, %arg1: i32, %arg2: i32) -> (i32, i32) {
    %c0_i32 = arith.constant 0 : i32
    return %arg0, %arg2 : i32, i32
  }
  func.func @transform_1(%arg0: i32, %arg1: i32, %arg2: i32) -> (i32, i32) {
    %c0_i32 = arith.constant 0 : i32
    return %arg2, %arg1 : i32, i32
  }
  func.func @transform_2(%arg0: i32, %arg1: i32, %arg2: i32) -> (i32, i32) {
    %c0_i32 = arith.constant 0 : i32
    %c0_i32_0 = arith.constant 0 : i32
    return %c0_i32, %arg1 : i32, i32
  }
  func.func @transform_3(%arg0: i32, %arg1: i32, %arg2: i32) -> (i32, i32) {
    %c0_i32 = arith.constant 0 : i32
    return %arg0, %arg1 : i32, i32
  }
}

module attributes {stable_mosaic.version = 11 : i64} {
  func.func @_linear_kernel(%arg0: i32, %arg1: i32, %arg2: i32, %arg3: memref<16x32xf32, #tpu.memory_space<vmem>>, %arg4: memref<32x64xbf16, #tpu.memory_space<vmem>>, %arg5: memref<1x64xf32, #tpu.memory_space<vmem>>, %arg6: memref<16x64xbf16, #tpu.memory_space<vmem>>, %arg7: memref<16x64xf32, #tpu.memory_space<vmem>>) attributes {dimension_semantics = [#tpu.dimension_semantics<parallel>, #tpu.dimension_semantics<parallel>, #tpu.dimension_semantics<arbitrary>], iteration_bounds = array<i64: 1, 1, 1>, scalar_prefetch = 0 : i64, scratch_operands = 1 : i64, tpu.core_type = #tpu.core_type<tc>, window_params = [{transform_indices = @transform_0, window_bounds = array<i64: 16, 32>}, {transform_indices = @transform_1, window_bounds = array<i64: 32, 64>}, {transform_indices = @transform_2, window_bounds = array<i64: 1, 64>}, {transform_indices = @transform_3, window_bounds = array<i64: 16, 64>}]} {
    %c0_i32 = arith.constant 0 : i32
    %0 = arith.cmpi eq, %arg2, %c0_i32 : i32
    %1 = arith.extui %0 : i1 to i32
    %c0_i32_0 = arith.constant 0 : i32
    %2 = arith.cmpi ne, %1, %c0_i32_0 : i32
    scf.if %2 {
      %cst_10 = arith.constant 0.000000e+00 : f32
      %13 = vector.broadcast %cst_10 : f32 to vector<16x64xf32>
      %c0_11 = arith.constant 0 : index
      %c0_12 = arith.constant 0 : index
      %14 = vector.load %arg7[%c0_11, %c0_12] : memref<16x64xf32, #tpu.memory_space<vmem>>, vector<16x64xf32>
      tpu.vector_store %arg7[%c0_11, %c0_12], %13 {strides = array<i32>} : memref<16x64xf32, #tpu.memory_space<vmem>>, vector<16x64xf32>,
    } else {
    }
    %c0 = arith.constant 0 : index
    %c0_1 = arith.constant 0 : index
    %3 = vector.load %arg7[%c0, %c0_1] : memref<16x64xf32, #tpu.memory_space<vmem>>, vector<16x64xf32>
    %c0_2 = arith.constant 0 : index
    %c0_3 = arith.constant 0 : index
    %4 = vector.load %arg3[%c0_2, %c0_3] : memref<16x32xf32, #tpu.memory_space<vmem>>, vector<16x32xf32>
    %5 = arith.truncf %4 : vector<16x32xf32> to vector<16x32xbf16>
    %c0_4 = arith.constant 0 : index
    %c0_5 = arith.constant 0 : index
    %6 = vector.load %arg4[%c0_4, %c0_5] : memref<32x64xbf16, #tpu.memory_space<vmem>>, vector<32x64xbf16>
    %cst = arith.constant dense<0.000000e+00> : vector<16x64xf32>
    %7 = tpu.matmul %5, %6, %cst {dimension_numbers = #tpu.dot_dimension_numbers<[1], [0], [0], [1], [0, 0, 1, 1], [], []>} : vector<16x32xbf16>, vector<32x64xbf16>, vector<16x64xf32> -> vector<16x64xf32>
    %8 = arith.addf %3, %7 : vector<16x64xf32>
    %c0_6 = arith.constant 0 : index
    %c0_7 = arith.constant 0 : index
    %9 = vector.load %arg7[%c0_6, %c0_7] : memref<16x64xf32, #tpu.memory_space<vmem>>, vector<16x64xf32>
    tpu.vector_store %arg7[%c0_6, %c0_7], %8 {strides = array<i32>} : memref<16x64xf32, #tpu.memory_space<vmem>>, vector<16x64xf32>,
    %c0_i32_8 = arith.constant 0 : i32
    %10 = arith.cmpi eq, %arg2, %c0_i32_8 : i32
    %11 = arith.extui %10 : i1 to i32
    %c0_i32_9 = arith.constant 0 : i32
    %12 = arith.cmpi ne, %11, %c0_i32_9 : i32
    scf.if %12 {
      %c0_10 = arith.constant 0 : index
      %c0_11 = arith.constant 0 : index
      %13 = vector.load %arg7[%c0_10, %c0_11] : memref<16x64xf32, #tpu.memory_space<vmem>>, vector<16x64xf32>
      %c0_12 = arith.constant 0 : index
      %c0_13 = arith.constant 0 : index
      %14 = vector.load %arg5[%c0_12, %c0_13] : memref<1x64xf32, #tpu.memory_space<vmem>>, vector<1x64xf32>
      %15 = vector.broadcast %14 : vector<1x64xf32> to vector<16x64xf32>
      %16 = arith.addf %13, %15 : vector<16x64xf32>
      %17 = arith.truncf %16 : vector<16x64xf32> to vector<16x64xbf16>
      %c0_14 = arith.constant 0 : index
      %c0_15 = arith.constant 0 : index
      %18 = vector.load %arg6[%c0_14, %c0_15] : memref<16x64xbf16, #tpu.memory_space<vmem>>, vector<16x64xbf16>
      tpu.vector_store %arg6[%c0_14, %c0_15], %17 {strides = array<i32>} : memref<16x64xbf16, #tpu.memory_space<vmem>>, vector<16x64xbf16>,
    } else {
    }
    return
  }
  func.func @transform_0(%arg0: i32, %arg1: i32, %arg2: i32) -> (i32, i32) {
    %c0_i32 = arith.constant 0 : i32
    return %arg0, %arg2 : i32, i32
  }
  func.func @transform_1(%arg0: i32, %arg1: i32, %arg2: i32) -> (i32, i32) {
    %c0_i32 = arith.constant 0 : i32
    return %arg2, %arg1 : i32, i32
  }
  func.func @transform_2(%arg0: i32, %arg1: i32, %arg2: i32) -> (i32, i32) {
    %c0_i32 = arith.constant 0 : i32
    %c0_i32_0 = arith.constant 0 : i32
    return %c0_i32, %arg1 : i32, i32
  }
  func.func @transform_3(%arg0: i32, %arg1: i32, %arg2: i32) -> (i32, i32) {
    %c0_i32 = arith.constant 0 : i32
    return %arg0, %arg1 : i32, i32
  }
}

module attributes {stable_mosaic.version = 11 : i64} {
  func.func @_ffn_kernel(%arg0: i32, %arg1: i32, %arg2: memref<16x32xf32, #tpu.memory_space<vmem>>, %arg3: memref<32x64xbf16, #tpu.memory_space<vmem>>, %arg4: memref<1x64xf32, #tpu.memory_space<vmem>>, %arg5: memref<64x32xbf16, #tpu.memory_space<vmem>>, %arg6: memref<1x32xf32, #tpu.memory_space<vmem>>, %arg7: memref<1x32xf32, #tpu.memory_space<vmem>>, %arg8: memref<1x32xf32, #tpu.memory_space<vmem>>, %arg9: memref<16x32xf32, #tpu.memory_space<vmem>>, %arg10: memref<16x32xf32, #tpu.memory_space<vmem>>) attributes {dimension_semantics = [#tpu.dimension_semantics<parallel>, #tpu.dimension_semantics<arbitrary>], iteration_bounds = array<i64: 1, 1>, scalar_prefetch = 0 : i64, scratch_operands = 1 : i64, tpu.core_type = #tpu.core_type<tc>, window_params = [{transform_indices = @transform_0, window_bounds = array<i64: 16, 32>}, {transform_indices = @transform_1, window_bounds = array<i64: 32, 64>}, {transform_indices = @transform_2, window_bounds = array<i64: 1, 64>}, {transform_indices = @transform_3, window_bounds = array<i64: 64, 32>}, {pipeline_mode = #tpu.pipeline_mode<synchronous>, transform_indices = @transform_4, window_bounds = array<i64: 1, 32>}, {pipeline_mode = #tpu.pipeline_mode<synchronous>, transform_indices = @transform_5, window_bounds = array<i64: 1, 32>}, {pipeline_mode = #tpu.pipeline_mode<synchronous>, transform_indices = @transform_6, window_bounds = array<i64: 1, 32>}, {transform_indices = @transform_7, window_bounds = array<i64: 16, 32>}]} {
    %c0_i32 = arith.constant 0 : i32
    %0 = arith.cmpi eq, %arg1, %c0_i32 : i32
    %1 = arith.extui %0 : i1 to i32
    %c0_i32_0 = arith.constant 0 : i32
    %2 = arith.cmpi ne, %1, %c0_i32_0 : i32
    scf.if %2 {
      %cst_16 = arith.constant 0.000000e+00 : f32
      %21 = vector.broadcast %cst_16 : f32 to vector<16x32xf32>
      %c0_17 = arith.constant 0 : index
      %c0_18 = arith.constant 0 : index
      %22 = vector.load %arg10[%c0_17, %c0_18] : memref<16x32xf32, #tpu.memory_space<vmem>>, vector<16x32xf32>
      tpu.vector_store %arg10[%c0_17, %c0_18], %21 {strides = array<i32>} : memref<16x32xf32, #tpu.memory_space<vmem>>, vector<16x32xf32>,
    } else {
    }
    %c0 = arith.constant 0 : index
    %c0_1 = arith.constant 0 : index
    %3 = vector.load %arg2[%c0, %c0_1] : memref<16x32xf32, #tpu.memory_space<vmem>>, vector<16x32xf32>
    %4 = arith.truncf %3 : vector<16x32xf32> to vector<16x32xbf16>
    %c0_2 = arith.constant 0 : index
    %c0_3 = arith.constant 0 : index
    %5 = vector.load %arg3[%c0_2, %c0_3] : memref<32x64xbf16, #tpu.memory_space<vmem>>, vector<32x64xbf16>
    %cst = arith.constant dense<0.000000e+00> : vector<16x64xf32>
    %6 = tpu.matmul %4, %5, %cst {dimension_numbers = #tpu.dot_dimension_numbers<[1], [0], [0], [1], [0, 0, 1, 1], [], []>} : vector<16x32xbf16>, vector<32x64xbf16>, vector<16x64xf32> -> vector<16x64xf32>
    %c0_4 = arith.constant 0 : index
    %c0_5 = arith.constant 0 : index
    %7 = vector.load %arg4[%c0_4, %c0_5] : memref<1x64xf32, #tpu.memory_space<vmem>>, vector<1x64xf32>
    %8 = vector.broadcast %7 : vector<1x64xf32> to vector<16x64xf32>
    %9 = arith.addf %6, %8 : vector<16x64xf32>
    %cst_6 = arith.constant 0.000000e+00 : f32
    %10 = vector.broadcast %cst_6 : f32 to vector<16x64xf32>
    %11 = arith.maximumf %9, %10 : vector<16x64xf32>
    %c0_7 = arith.constant 0 : index
    %c0_8 = arith.constant 0 : index
    %12 = vector.load %arg10[%c0_7, %c0_8] : memref<16x32xf32, #tpu.memory_space<vmem>>, vector<16x32xf32>
    %13 = arith.truncf %11 : vector<16x64xf32> to vector<16x64xbf16>
    %c0_9 = arith.constant 0 : index
    %c0_10 = arith.constant 0 : index
    %14 = vector.load %arg5[%c0_9, %c0_10] : memref<64x32xbf16, #tpu.memory_space<vmem>>, vector<64x32xbf16>
    %cst_11 = arith.constant dense<0.000000e+00> : vector<16x32xf32>
    %15 = tpu.matmul %13, %14, %cst_11 {dimension_numbers = #tpu.dot_dimension_numbers<[1], [0], [0], [1], [0, 0, 1, 1], [], []>} : vector<16x64xbf16>, vector<64x32xbf16>, vector<16x32xf32> -> vector<16x32xf32>
    %16 = arith.addf %12, %15 : vector<16x32xf32>
    %c0_12 = arith.constant 0 : index
    %c0_13 = arith.constant 0 : index
    %17 = vector.load %arg10[%c0_12, %c0_13] : memref<16x32xf32, #tpu.memory_space<vmem>>, vector<16x32xf32>
    tpu.vector_store %arg10[%c0_12, %c0_13], %16 {strides = array<i32>} : memref<16x32xf32, #tpu.memory_space<vmem>>, vector<16x32xf32>,
    %c0_i32_14 = arith.constant 0 : i32
    %18 = arith.cmpi eq, %arg1, %c0_i32_14 : i32
    %19 = arith.extui %18 : i1 to i32
    %c0_i32_15 = arith.constant 0 : i32
    %20 = arith.cmpi ne, %19, %c0_i32_15 : i32
    scf.if %20 {
      %c0_16 = arith.constant 0 : index
      %c0_17 = arith.constant 0 : index
      %21 = vector.load %arg10[%c0_16, %c0_17] : memref<16x32xf32, #tpu.memory_space<vmem>>, vector<16x32xf32>
      %c0_18 = arith.constant 0 : index
      %c0_19 = arith.constant 0 : index
      %22 = vector.load %arg6[%c0_18, %c0_19] : memref<1x32xf32, #tpu.memory_space<vmem>>, vector<1x32xf32>
      %23 = vector.broadcast %22 : vector<1x32xf32> to vector<16x32xf32>
      %24 = arith.addf %21, %23 : vector<16x32xf32>
      %c0_20 = arith.constant 0 : index
      %c0_21 = arith.constant 0 : index
      %25 = vector.load %arg2[%c0_20, %c0_21] : memref<16x32xf32, #tpu.memory_space<vmem>>, vector<16x32xf32>
      %26 = arith.addf %24, %25 : vector<16x32xf32>
      %cst_22 = arith.constant dense<0.000000e+00> : vector<16xf32>
      %27 = vector.multi_reduction <add>, %26, %cst_22 [1] : vector<16x32xf32> to vector<16xf32>
      %28 = vector.shape_cast %27 : vector<16xf32> to vector<16x1xf32>
      %cst_23 = arith.constant 3.200000e+01 : f32
      %29 = vector.broadcast %cst_23 : f32 to vector<16x1xf32>
      %30 = arith.divf %28, %29 : vector<16x1xf32>
      %31 = vector.broadcast %30 : vector<16x1xf32> to vector<16x32xf32>
      %32 = arith.subf %26, %31 : vector<16x32xf32>
      %33 = arith.mulf %32, %32 : vector<16x32xf32>
      %cst_24 = arith.constant dense<0.000000e+00> : vector<16xf32>
      %34 = vector.multi_reduction <add>, %33, %cst_24 [1] : vector<16x32xf32> to vector<16xf32>
      %35 = vector.shape_cast %34 : vector<16xf32> to vector<16x1xf32>
      %cst_25 = arith.constant 3.200000e+01 : f32
      %36 = vector.broadcast %cst_25 : f32 to vector<16x1xf32>
      %37 = arith.divf %35, %36 : vector<16x1xf32>
      %cst_26 = arith.constant 9.99999974E-6 : f32
      %38 = vector.broadcast %cst_26 : f32 to vector<16x1xf32>
      %39 = arith.addf %37, %38 : vector<16x1xf32>
      %40 = math.rsqrt %39 : vector<16x1xf32>
      %41 = vector.broadcast %40 : vector<16x1xf32> to vector<16x32xf32>
      %42 = arith.mulf %32, %41 : vector<16x32xf32>
      %c0_27 = arith.constant 0 : index
      %c0_28 = arith.constant 0 : index
      %43 = vector.load %arg7[%c0_27, %c0_28] : memref<1x32xf32, #tpu.memory_space<vmem>>, vector<1x32xf32>
      %44 = vector.broadcast %43 : vector<1x32xf32> to vector<16x32xf32>
      %45 = arith.mulf %42, %44 : vector<16x32xf32>
      %c0_29 = arith.constant 0 : index
      %c0_30 = arith.constant 0 : index
      %46 = vector.load %arg8[%c0_29, %c0_30] : memref<1x32xf32, #tpu.memory_space<vmem>>, vector<1x32xf32>
      %47 = vector.broadcast %46 : vector<1x32xf32> to vector<16x32xf32>
      %48 = arith.addf %45, %47 : vector<16x32xf32>
      %c0_31 = arith.constant 0 : index
      %c0_32 = arith.constant 0 : index
      %49 = vector.load %arg9[%c0_31, %c0_32] : memref<16x32xf32, #tpu.memory_space<vmem>>, vector<16x32xf32>
      tpu.vector_store %arg9[%c0_31, %c0_32], %48 {strides = array<i32>} : memref<16x32xf32, #tpu.memory_space<vmem>>, vector<16x32xf32>,
    } else {
    }
    return
  }
  func.func @transform_0(%arg0: i32, %arg1: i32) -> (i32, i32) {
    %c0_i32 = arith.constant 0 : i32
    %c0_i32_0 = arith.constant 0 : i32
    return %arg0, %c0_i32 : i32, i32
  }
  func.func @transform_1(%arg0: i32, %arg1: i32) -> (i32, i32) {
    %c0_i32 = arith.constant 0 : i32
    %c0_i32_0 = arith.constant 0 : i32
    return %c0_i32, %arg1 : i32, i32
  }
  func.func @transform_2(%arg0: i32, %arg1: i32) -> (i32, i32) {
    %c0_i32 = arith.constant 0 : i32
    %c0_i32_0 = arith.constant 0 : i32
    return %c0_i32, %arg1 : i32, i32
  }
  func.func @transform_3(%arg0: i32, %arg1: i32) -> (i32, i32) {
    %c0_i32 = arith.constant 0 : i32
    %c0_i32_0 = arith.constant 0 : i32
    return %arg1, %c0_i32 : i32, i32
  }
  func.func @transform_4(%arg0: i32, %arg1: i32) -> (i32, i32) {
    %c0_i32 = arith.constant 0 : i32
    %c0_i32_0 = arith.constant 0 : i32
    %c0_i32_1 = arith.constant 0 : i32
    return %c0_i32, %c0_i32_0 : i32, i32
  }
  func.func @transform_5(%arg0: i32, %arg1: i32) -> (i32, i32) {
    %c0_i32 = arith.constant 0 : i32
    %c0_i32_0 = arith.constant 0 : i32
    %c0_i32_1 = arith.constant 0 : i32
    return %c0_i32, %c0_i32_0 : i32, i32
  }
  func.func @transform_6(%arg0: i32, %arg1: i32) -> (i32, i32) {
    %c0_i32 = arith.constant 0 : i32
    %c0_i32_0 = arith.constant 0 : i32
    %c0_i32_1 = arith.constant 0 : i32
    return %c0_i32, %c0_i32_0 : i32, i32
  }
  func.func @transform_7(%arg0: i32, %arg1: i32) -> (i32, i32) {
    %c0_i32 = arith.constant 0 : i32
    %c0_i32_0 = arith.constant 0 : i32
    return %arg0, %c0_i32 : i32, i32
  }
}

module attributes {stable_mosaic.version = 11 : i64} {
  func.func @_linear_kernel(%arg0: i32, %arg1: i32, %arg2: i32, %arg3: memref<16x32xf32, #tpu.memory_space<vmem>>, %arg4: memref<32x50xbf16, #tpu.memory_space<vmem>>, %arg5: memref<1x50xf32, #tpu.memory_space<vmem>>, %arg6: memref<16x50xf32, #tpu.memory_space<vmem>>, %arg7: memref<16x50xf32, #tpu.memory_space<vmem>>) attributes {dimension_semantics = [#tpu.dimension_semantics<parallel>, #tpu.dimension_semantics<parallel>, #tpu.dimension_semantics<arbitrary>], iteration_bounds = array<i64: 1, 1, 1>, scalar_prefetch = 0 : i64, scratch_operands = 1 : i64, tpu.core_type = #tpu.core_type<tc>, window_params = [{transform_indices = @transform_0, window_bounds = array<i64: 16, 32>}, {transform_indices = @transform_1, window_bounds = array<i64: 32, 50>}, {transform_indices = @transform_2, window_bounds = array<i64: 1, 50>}, {transform_indices = @transform_3, window_bounds = array<i64: 16, 50>}]} {
    %c0_i32 = arith.constant 0 : i32
    %0 = arith.cmpi eq, %arg2, %c0_i32 : i32
    %1 = arith.extui %0 : i1 to i32
    %c0_i32_0 = arith.constant 0 : i32
    %2 = arith.cmpi ne, %1, %c0_i32_0 : i32
    scf.if %2 {
      %cst_10 = arith.constant 0.000000e+00 : f32
      %13 = vector.broadcast %cst_10 : f32 to vector<16x50xf32>
      %c0_11 = arith.constant 0 : index
      %c0_12 = arith.constant 0 : index
      %14 = vector.load %arg7[%c0_11, %c0_12] : memref<16x50xf32, #tpu.memory_space<vmem>>, vector<16x50xf32>
      tpu.vector_store %arg7[%c0_11, %c0_12], %13 {strides = array<i32>} : memref<16x50xf32, #tpu.memory_space<vmem>>, vector<16x50xf32>,
    } else {
    }
    %c0 = arith.constant 0 : index
    %c0_1 = arith.constant 0 : index
    %3 = vector.load %arg7[%c0, %c0_1] : memref<16x50xf32, #tpu.memory_space<vmem>>, vector<16x50xf32>
    %c0_2 = arith.constant 0 : index
    %c0_3 = arith.constant 0 : index
    %4 = vector.load %arg3[%c0_2, %c0_3] : memref<16x32xf32, #tpu.memory_space<vmem>>, vector<16x32xf32>
    %5 = arith.truncf %4 : vector<16x32xf32> to vector<16x32xbf16>
    %c0_4 = arith.constant 0 : index
    %c0_5 = arith.constant 0 : index
    %6 = vector.load %arg4[%c0_4, %c0_5] : memref<32x50xbf16, #tpu.memory_space<vmem>>, vector<32x50xbf16>
    %cst = arith.constant dense<0.000000e+00> : vector<16x50xf32>
    %7 = tpu.matmul %5, %6, %cst {dimension_numbers = #tpu.dot_dimension_numbers<[1], [0], [0], [1], [0, 0, 1, 1], [], []>} : vector<16x32xbf16>, vector<32x50xbf16>, vector<16x50xf32> -> vector<16x50xf32>
    %8 = arith.addf %3, %7 : vector<16x50xf32>
    %c0_6 = arith.constant 0 : index
    %c0_7 = arith.constant 0 : index
    %9 = vector.load %arg7[%c0_6, %c0_7] : memref<16x50xf32, #tpu.memory_space<vmem>>, vector<16x50xf32>
    tpu.vector_store %arg7[%c0_6, %c0_7], %8 {strides = array<i32>} : memref<16x50xf32, #tpu.memory_space<vmem>>, vector<16x50xf32>,
    %c0_i32_8 = arith.constant 0 : i32
    %10 = arith.cmpi eq, %arg2, %c0_i32_8 : i32
    %11 = arith.extui %10 : i1 to i32
    %c0_i32_9 = arith.constant 0 : i32
    %12 = arith.cmpi ne, %11, %c0_i32_9 : i32
    scf.if %12 {
      %c0_10 = arith.constant 0 : index
      %c0_11 = arith.constant 0 : index
      %13 = vector.load %arg7[%c0_10, %c0_11] : memref<16x50xf32, #tpu.memory_space<vmem>>, vector<16x50xf32>
      %c0_12 = arith.constant 0 : index
      %c0_13 = arith.constant 0 : index
      %14 = vector.load %arg5[%c0_12, %c0_13] : memref<1x50xf32, #tpu.memory_space<vmem>>, vector<1x50xf32>
      %15 = vector.broadcast %14 : vector<1x50xf32> to vector<16x50xf32>
      %16 = arith.addf %13, %15 : vector<16x50xf32>
      %c0_14 = arith.constant 0 : index
      %c0_15 = arith.constant 0 : index
      %17 = vector.load %arg6[%c0_14, %c0_15] : memref<16x50xf32, #tpu.memory_space<vmem>>, vector<16x50xf32>
      tpu.vector_store %arg6[%c0_14, %c0_15], %16 {strides = array<i32>} : memref<16x50xf32, #tpu.memory_space<vmem>>, vector<16x50xf32>,
    } else {
    }
    return
  }
  func.func @transform_0(%arg0: i32, %arg1: i32, %arg2: i32) -> (i32, i32) {
    %c0_i32 = arith.constant 0 : i32
    return %arg0, %arg2 : i32, i32
  }
  func.func @transform_1(%arg0: i32, %arg1: i32, %arg2: i32) -> (i32, i32) {
    %c0_i32 = arith.constant 0 : i32
    return %arg2, %arg1 : i32, i32
  }
  func.func @transform_2(%arg0: i32, %arg1: i32, %arg2: i32) -> (i32, i32) {
    %c0_i32 = arith.constant 0 : i32
    %c0_i32_0 = arith.constant 0 : i32
    return %c0_i32, %arg1 : i32, i32
  }
  func.func @transform_3(%arg0: i32, %arg1: i32, %arg2: i32) -> (i32, i32) {
    %c0_i32 = arith.constant 0 : i32
    return %arg0, %arg1 : i32, i32
  }
}

</mosaic_0001>

<bundles_post_ra>
// kernel: decoder_forward.9
= control target key start
LH: loop header
LB: loop body
LE: loop exit
PB: predicated region body
PF: predicated region fallthrough
CT: control target
= control target key end

     0   :  { %8 = vsyncpa [#allocation4], 0  ;;  %s145_s15 = smov [#allocation3]   ;;  %s146_s17 = smov 128   ;;  %s191_s0 = inlined_call_operand.hbm [shape: f32[16,32], index: 0, kind: input, shape index: {}]   ;;  %s192_s1 = inlined_call_operand.vmem [shape: bf16[32,96], index: 1, kind: input, shape index: {}]   ;;  %s193_s2 = inlined_call_operand.vmem [shape: f32[1,96], index: 2, kind: input, shape index: {}]   ;;  %s194_s3 = inlined_call_operand.vmem [shape: bf16[16,96], index: 3, kind: output, shape index: {}]  }
   0x1   :  { %s13_s14 = sshll.u32 %s191_s0, 4  ;;  %s15_s16 = sshll.u32 %s145_s15, 4  ;;  %s14_s14 = int_to_ptr.hbm [resolvable:$true] %s13_s14  ;;  %s16_s16 = int_to_ptr.vmem [resolvable:$true] %s15_s16 }
   0x2   :  { %s147_s18 = smov 8  }
   0x3   :  { %21 = dma.hbm_to_vmem [thread:$0]  %s14_s14, 256, %s16_s16, [#allocation4], %s146_s17, %s146_s17, %s147_s18  }
   0x4   :  { %143 = dma.done.wait [#allocation4], 256  }
   0x5   :  { %144 = vsyncadd [#allocation4], 4294967040  ;;  %vm35_vm0 = vcmask 785408   ;;  %v148_v0 = vmov 0.0   ;;  %v113_v1 = vld [vmem:[%s192_s1 + $0x8] sm:$0xff]  ;;  %v112_v2 = vld [vmem:[%s192_s1] sm:$0xff] }
   0x6   :  { %36 = vst.msk [vmem:[#allocation2] sm:$0xff] %vm35_vm0, %v148_v0  ;;  %69 = vmatpush.bf16.msra.mxu0 %v113_v1  ;;  %v40_v3 = vld [vmem:[#allocation3] sm:$0xff]  ;;  %v41_v4 = vld [vmem:[#allocation3 + $0x8] sm:$0xff]  ;;  %vm59_vm1 = vcmask 261120   ;;  %v118_v10 = vld [vmem:[%s193_s2] ss:$0 sm:$0xff] }
   0x7   :  { %37 = vst.msk [vmem:[#allocation2 + $0x8] sm:$0xff] %vm35_vm0, %v148_v0  ;;  %v42_v5 = vpack.c.bf16 %v41_v4, %v40_v3  ;;  %vm95_vm2 = vcmask 781312  }
   0xa   :  { %70 = vmatpush.bf16.msra.mxu0 %v112_v2 }
   0xd   :  { %111 = vmatmul.msk.bf16.vlgmr.msra.gmra.mxu0 %vm59_vm1, %v42_v5  ;;  %v38_v6 = vld [vmem:[#allocation2] sm:$0xff] }
   0xe   :  { %v39_v9 = vld [vmem:[#allocation2 + $0x8] sm:$0xff] }
  0x8a   :  { %v72_v7 = vpop.f32.mrf.mxu0 }
  0x8b   :  { %v77_v8 = vadd.f32 %v72_v7, %v38_v6 }
  0x8d   :  { %80 = vst.msk [vmem:[#allocation2] sm:$0xff] %vm35_vm0, %v77_v8 }
  0x92   :  { %v74_v11 = vpop.f32.mrf.mxu0 }
  0x93   :  { %v78_v12 = vadd.f32 %v74_v11, %v39_v9 }
  0x94   :  { %v85_v13 = vld [vmem:[#allocation2] sm:$0xff] }
  0x95   :  { %v91_v14 = vadd.f32 %v118_v10, %v85_v13  ;;  %81 = vst.msk [vmem:[#allocation2 + $0x8] sm:$0xff] %vm35_vm0, %v78_v12 }
  0x97   :  { %v93_v15 = vpack.c.bf16 %v91_v14, %v91_v14 }
  0x99   :  { %96 = vst.msk [vmem:[%s194_s3] sm:$0xf] %vm95_vm2, %v93_v15 }
  0x9c   :  { %v86_v16 = vld [vmem:[#allocation2 + $0x8] sm:$0xff] }
  0x9d   :  { %v92_v17 = vadd.f32 %v118_v10, %v86_v16 }
  0x9f   :  { %v94_v18 = vpack.c.bf16 %v92_v17, %v92_v17 }
  0xa1   :  { %97 = vst.msk [vmem:[%s194_s3 + $0x4] sm:$0xf] %vm95_vm2, %v94_v18 }
  0xa2   :  { %102 = vsyncpa [#allocation4], 1 }

// kernel: decoder_forward.11
= control target key start
LH: loop header
LB: loop body
LE: loop exit
PB: predicated region body
PF: predicated region fallthrough
CT: control target
= control target key end

     0   :  { %vm51_vm0 = vcmask 261120   ;;  %v168_v14 = vmov 32.0   ;;  %s241_s1 = inlined_call_operand.vmem [shape: bf16[32,32], index: 1, kind: input, shape index: {}]   ;;  %s242_s2 = inlined_call_operand.vmem [shape: f32[1,32], index: 2, kind: input, shape index: {}]   ;;  %s243_s0 = inlined_call_operand.vmem [shape: bf16[16,32], index: 0, kind: input, shape index: {}]   ;;  %s244_s3 = inlined_call_operand.vmem [shape: f32[16,32], index: 3, kind: input, shape index: {}]   ;;  %s245_s4 = inlined_call_operand.vmem [shape: f32[1,32], index: 4, kind: input, shape index: {}]   ;;  %s246_s5 = inlined_call_operand.vmem [shape: f32[1,32], index: 5, kind: input, shape index: {}]   ;;  %s247_s6 = inlined_call_operand.vmem [shape: f32[16,32], index: 6, kind: output, shape index: {}]  }
   0x1   :  { %v157_v0 = vld [vmem:[%s241_s1 + $0x8] sm:$0xff]  ;;  %v156_v1 = vld [vmem:[%s241_s1] sm:$0xff]  ;;  %162 = vrcp.f32 %v168_v14 }
   0x2   :  { %61 = vmatpush.bf16.msra.mxu0 %v157_v0  ;;  %v155_v2 = vld [vmem:[%s243_s0] sm:$0xff]  ;;  %v70_v10 = vld [vmem:[%s244_s3 + $0x8] sm:$0xff] }
   0x3   :  { %v159_v3 = vld [vmem:[%s242_s2] ss:$0 sm:$0xff] }
   0x4   :  { %v69_v5 = vld [vmem:[%s244_s3] sm:$0xff] }
   0x5   :  { %v160_v45 = vld [vmem:[%s245_s4] ss:$0 sm:$0xff] }
   0x6   :  { %62 = vmatpush.bf16.msra.mxu0 %v156_v1  ;;  %v161_v48 = vld [vmem:[%s246_s5] ss:$0 sm:$0xff] }
   0x7   :  { %v163_v15 = vpop.eup %162 }
   0x8   :  { %v80_v16 = vmul.f32 32.0, %v163_v15  ;;  %vm84_vm1 = vweird.f32 %v163_v15 }
   0x9   :  { %154 = vmatmul.msk.bf16.vlgmr.msra.gmra.mxu0 %vm51_vm0, %v155_v2 }
   0xa   :  { %v81_v17 = vsub.f32 1.0, %v80_v16 }
   0xc   :  { %v82_v18 = vmul.f32 %v163_v15, %v81_v17 }
   0xe   :  { %v83_v19 = vadd.f32 %v163_v15, %v82_v18 }
  0x10   :  { %v85_v20 = vsel %vm84_vm1, %v163_v15, %v83_v19 }
  0x86   :  { %v64_v4 = vpop.f32.mrf.mxu0 }
  0x87   :  { %v65_v6 = vadd.f32 %v159_v3, %v64_v4 }
  0x89   :  { %v71_v7 = vadd.f32 %v69_v5, %v65_v6 }
  0x8b   :  { %v73_v8 = vsel %vm51_vm0, %v71_v7, 0.0 }
  0x8c   :  { %74 = vadd.xlane.f32.xlu0 %v73_v8 }
  0x8e   :  { %v66_v9 = vpop.f32.mrf.mxu0 }
  0x8f   :  { %v67_v11 = vadd.f32 %v159_v3, %v66_v9 }
  0x91   :  { %v72_v12 = vadd.f32 %v70_v10, %v67_v11 }
  0x93   :  { %v76_v13 = vsel %vm51_vm0, %v72_v12, 0.0 }
  0x94   :  { %77 = vadd.xlane.f32.xlu0 %v76_v13 }
  0xff   :  { %v75_v21 = vpop.xlane.xlu0 %74 }
 0x100   :  { %v86_v22 = vmul.f32 %v85_v20, %v75_v21 }
 0x102   :  { %v88_v23 = vsub.f32 %v71_v7, %v86_v22 }
 0x104   :  { %v90_v24 = vmul.f32 %v88_v23, %v88_v23 }
 0x106   :  { %v92_v25 = vsel %vm51_vm0, %v90_v24, 0.0 }
 0x107   :  { %93 = vadd.xlane.f32.xlu1 %v92_v25  ;;  %v78_v26 = vpop.xlane.xlu0 %77 }
 0x108   :  { %v87_v27 = vmul.f32 %v85_v20, %v78_v26 }
 0x10a   :  { %v89_v28 = vsub.f32 %v72_v12, %v87_v27 }
 0x10c   :  { %v91_v29 = vmul.f32 %v89_v28, %v89_v28 }
 0x10e   :  { %v95_v30 = vsel %vm51_vm0, %v91_v29, 0.0 }
 0x10f   :  { %96 = vadd.xlane.f32.xlu1 %v95_v30 }
 0x17a   :  { %v94_v31 = vpop.xlane.xlu1 %93 }
 0x17b   :  { %v98_v32 = vmul.f32 %v94_v31, %v85_v20 }
 0x17d   :  { %v100_v33 = vadd.f32 1e-05, %v98_v32 }
 0x17f   :  { %164 = vrsqrt.f32 %v100_v33  ;;  %vm108_vm3 = vweird.f32 %v100_v33 }
 0x182   :  { %v97_v34 = vpop.xlane.xlu1 %96 }
 0x183   :  { %v99_v35 = vmul.f32 %v97_v34, %v85_v20 }
 0x185   :  { %v165_v36 = vpop.eup %164  ;;  %v101_v37 = vadd.f32 1e-05, %v99_v35 }
 0x186   :  { %v103_v38 = vmul.f32 %v165_v36, %v100_v33  ;;  %vm109_vm2 = vweird.f32 %v165_v36 }
 0x187   :  { %166 = vrsqrt.f32 %v101_v37  ;;  %vm110_vm4 = vmor %vm108_vm3, %vm109_vm2  ;;  %vm118_vm6 = vweird.f32 %v101_v37 }
 0x188   :  { %v104_v39 = vmul.f32 %v165_v36, %v103_v38 }
 0x18a   :  { %v105_v40 = vmul.f32 0.5, %v104_v39 }
 0x18c   :  { %v106_v41 = vsub.f32 1.5, %v105_v40 }
 0x18d   :  { %v167_v42 = vpop.eup %166 }
 0x18e   :  { %v107_v43 = vmul.f32 %v165_v36, %v106_v41  ;;  %v113_v44 = vmul.f32 %v167_v42, %v101_v37  ;;  %vm119_vm5 = vweird.f32 %v167_v42 }
 0x18f   :  { %vm120_vm7 = vmor %vm118_vm6, %vm119_vm5 }
 0x190   :  { %v111_v46 = vsel %vm110_vm4, %v165_v36, %v107_v43  ;;  %v114_v47 = vmul.f32 %v167_v42, %v113_v44 }
 0x191   :  { %v122_v49 = vmul.f32 %v111_v46, %v88_v23 }
 0x192   :  { %v115_v50 = vmul.f32 0.5, %v114_v47 }
 0x193   :  { %v128_v51 = vmul.f32 %v160_v45, %v122_v49 }
 0x194   :  { %v116_v52 = vsub.f32 1.5, %v115_v50 }
 0x195   :  { %v134_v53 = vadd.f32 %v161_v48, %v128_v51 }
 0x196   :  { %v117_v54 = vmul.f32 %v167_v42, %v116_v52 }
 0x197   :  { %136 = vst.msk [vmem:[%s247_s6] sm:$0xff] %vm51_vm0, %v134_v53 }
 0x198   :  { %v121_v55 = vsel %vm120_vm7, %v167_v42, %v117_v54 }
 0x199   :  { %v123_v56 = vmul.f32 %v121_v55, %v89_v28 }
 0x19b   :  { %v129_v57 = vmul.f32 %v160_v45, %v123_v56 }
 0x19d   :  { %v135_v58 = vadd.f32 %v161_v48, %v129_v57 }
 0x19f   :  { %137 = vst.msk [vmem:[%s247_s6 + $0x8] sm:$0xff] %vm51_vm0, %v135_v58 }

// kernel: decoder_forward.12
= control target key start
LH: loop header
LB: loop body
LE: loop exit
PB: predicated region body
PF: predicated region fallthrough
CT: control target
= control target key end

     0   :  { %vm19_vm0 = vcmask 261120   ;;  %v98_v1 = vmov 0.0   ;;  %vm78_vm1 = vcmask 257024   ;;  %s145_s1 = inlined_call_operand.vmem [shape: bf16[32,32], index: 1, kind: input, shape index: {}]   ;;  %s146_s0 = inlined_call_operand.vmem [shape: f32[16,32], index: 0, kind: input, shape index: {}]   ;;  %s147_s2 = inlined_call_operand.vmem [shape: f32[1,32], index: 2, kind: input, shape index: {}]   ;;  %s148_s3 = inlined_call_operand.vmem [shape: bf16[16,32], index: 3, kind: output, shape index: {}]  }
   0x1   :  { %v95_v0 = vld [vmem:[%s145_s1 + $0x8] sm:$0xff]  ;;  %20 = vst.msk [vmem:[#allocation2] sm:$0xff] %vm19_vm0, %v98_v1  ;;  %v94_v2 = vld [vmem:[%s145_s1] sm:$0xff] }
   0x2   :  { %21 = vst.msk [vmem:[#allocation2 + $0x8] sm:$0xff] %vm19_vm0, %v98_v1  ;;  %53 = vmatpush.bf16.msra.mxu0 %v95_v0  ;;  %v24_v3 = vld [vmem:[%s146_s0] sm:$0xff]  ;;  %v25_v4 = vld [vmem:[%s146_s0 + $0x8] sm:$0xff] }
   0x3   :  { %v26_v5 = vpack.c.bf16 %v25_v4, %v24_v3  ;;  %v97_v10 = vld [vmem:[%s147_s2] ss:$0 sm:$0xff] }
   0x6   :  { %54 = vmatpush.bf16.msra.mxu0 %v94_v2 }
   0x8   :  { %v22_v6 = vld [vmem:[#allocation2] sm:$0xff] }
   0x9   :  { %93 = vmatmul.msk.bf16.vlgmr.msra.gmra.mxu0 %vm19_vm0, %v26_v5  ;;  %v23_v9 = vld [vmem:[#allocation2 + $0x8] sm:$0xff] }
  0x86   :  { %v56_v7 = vpop.f32.mrf.mxu0 }
  0x87   :  { %v61_v8 = vadd.f32 %v56_v7, %v22_v6 }
  0x89   :  { %63 = vst.msk [vmem:[#allocation2] sm:$0xff] %vm19_vm0, %v61_v8 }
  0x8e   :  { %v58_v11 = vpop.f32.mrf.mxu0 }
  0x8f   :  { %v62_v12 = vadd.f32 %v58_v11, %v23_v9 }
  0x90   :  { %v68_v13 = vld [vmem:[#allocation2] sm:$0xff] }
  0x91   :  { %v74_v14 = vadd.f32 %v97_v10, %v68_v13  ;;  %64 = vst.msk [vmem:[#allocation2 + $0x8] sm:$0xff] %vm19_vm0, %v62_v12 }
  0x93   :  { %v76_v15 = vpack.c.bf16 %v74_v14, %v74_v14 }
  0x95   :  { %79 = vst.msk [vmem:[%s148_s3] sm:$0xf] %vm78_vm1, %v76_v15 }
  0x98   :  { %v69_v16 = vld [vmem:[#allocation2 + $0x8] sm:$0xff] }
  0x99   :  { %v75_v17 = vadd.f32 %v97_v10, %v69_v16 }
  0x9b   :  { %v77_v18 = vpack.c.bf16 %v75_v17, %v75_v17 }
  0x9d   :  { %80 = vst.msk [vmem:[%s148_s3 + $0x4] sm:$0xf] %vm78_vm1, %v77_v18 }

// kernel: decoder_forward.10
= control target key start
LH: loop header
LB: loop body
LE: loop exit
PB: predicated region body
PF: predicated region fallthrough
CT: control target
= control target key end

     0   :  { %s993_s15 = smov 0   ;;  %s995_s16 = smov 0   ;;  %s1142_s0 = inlined_call_operand.vmem [shape: bf16[2,4,8,8], index: 0, kind: input, shape index: {}]   ;;  %s1143_s1 = inlined_call_operand.vmem [shape: bf16[2,4,8,8], index: 1, kind: input, shape index: {}]   ;;  %s1144_s2 = inlined_call_operand.vmem [shape: bf16[2,4,8,8], index: 2, kind: input, shape index: {}]   ;;  %s1145_s3 = inlined_call_operand.vmem [shape: bf16[2,8,8], index: 3, kind: input, shape index: {}]   ;;  %s1146_s4 = inlined_call_operand.vmem [shape: bf16[2,4,8,8], index: 4, kind: output, shape index: {}]  }
   0x1   :  { %s997_s17 = smov 0  }
   0x2 LB: > { %s33_s18 = sadd.s32 1, %s959_s16  ;;  %p863_p0 = scmp.ge.s32.totalorder %s963_s17, 1  ;;  %s963_s17 = sphi %s997_s17, %s14_s17   ;;  %s959_s16 = sphi %s995_s16, %s1148_s16   ;;  %s955_s15 = sphi %s993_s15, %s1147_s15  }
   0x3   : > { %p35_p1 = scmp.ge.s32.totalorder %s33_s18, 2  ;;  %p237_p2 = scmp.lt.s32.totalorder %s963_s17, 3 }
   0x5   : > { %s1150_s18 = smov (%p35_p1, %s33_s18), 0  ;;  %p238_p3 = pnand %p863_p0, %p237_p2 }
   0x6   : > { %p295_p4 = scmp.lt.s32.totalorder (!%p238_p3), %s955_s15, 1 }
   0x7   : > { %241 = sbr.rel (%p238_p3) target bundleno = 702 (0x2be), region = 36 }
   0xc   : > { %s1152_s15 = smov (!%p295_p4, %s955_s15), 1  ;;  %vm351_vm0 = vcmask 64512   ;;  %vm342_vm1 = vcmask 7168   ;;  %v965_v13 = vmov -inf   ;;  %v966_v37 = vmov 0  }
   0xd   : > { %s1011_s19 = sshll.u32 %s1152_s15, 4  ;;  %s870_s26 = sshll.u32 %s1152_s15, 2  ;;  %343 = vst.msk [vmem:[#allocation2] sm:$0xff] %vm342_vm1, %v965_v13  ;;  %915 = vset.pattern.permute.xlu0 %v966_v37  ;;  %914 = vset.pattern.permute.xlu2 %v966_v37  ;;  %v967_v38 = vmov 0.0   ;;  %vm585_vm2 = vcmask 1043456   ;;  %vm714_vm3 = vcmask 60416  }
   0xe   : > { %s310_s22 = scalar_lea.vmem %s1143_s1, %s1011_s19  ;;  %s302_s25 = scalar_lea.vmem %s1142_s0, %s1011_s19  ;;  %344 = vst.msk [vmem:[#allocation2 + $0x8] sm:$0xff] %vm342_vm1, %v965_v13  ;;  %916 = vset.pattern.permute.xlu1 %v966_v37 }
   0xf   : > { %v360_v0 = vld [vmem:[%s310_s22] sm:$0xf]  ;;  %v362_v1 = vld [vmem:[%s310_s22 + $0x8] sm:$0xf]  ;;  %v361_v4 = vld [vmem:[%s310_s22 + $0x4] sm:$0xf]  ;;  %s328_s29 = scalar_lea.vmem %s1145_s3, %s870_s26  ;;  %s318_s6 = scalar_lea.vmem %s1144_s2, %s1011_s19 }
  0x10   : > { %v373_v2 = vsel %vm351_vm0, %v360_v0, 0  ;;  %v411_v3 = vsel %vm351_vm0, %v362_v1, 0  ;;  %v392_v5 = vsel %vm351_vm0, %v361_v4, 0  ;;  %v363_v6 = vld [vmem:[%s310_s22 + $0xc] sm:$0xf]  ;;  %345 = vst.msk [vmem:[#allocation2 + $0x10] sm:$0xff] %vm342_vm1, %v965_v13  ;;  %s336_s9 = scalar_lea.vmem %s1146_s4, %s1011_s19 }
  0x11   : > { %382 = vmatpush.bf16.xpose.msra.mxu0 %v373_v2  ;;  %420 = vmatpush.bf16.xpose.msra.mxu2 %v411_v3  ;;  %v430_v7 = vsel %vm351_vm0, %v363_v6, 0  ;;  %v356_v8 = vld [vmem:[%s302_s25] sm:$0xf]  ;;  %v358_v9 = vld [vmem:[%s302_s25 + $0x8] sm:$0xf]  ;;  %346 = vst.msk [vmem:[#allocation2 + $0x18] sm:$0xff] %vm342_vm1, %v965_v13 }
  0x12   : > { %401 = vmatpush.bf16.xpose.msra.mxu1 %v392_v5  ;;  %439 = vmatpush.bf16.xpose.msra.mxu3 %v430_v7  ;;  %v357_v10 = vld [vmem:[%s302_s25 + $0x4] sm:$0xf]  ;;  %v359_v11 = vld [vmem:[%s302_s25 + $0xc] sm:$0xf]  ;;  %v449_v12 = vld [vmem:[%s328_s29] sm:$0xf] }
  0x13   : > { %v450_v14 = vunpack.c.l.bf16 %v449_v12  ;;  %349 = vst.msk [vmem:[#allocation3 + $0x10] sm:$0xff] %vm342_vm1, %v967_v38  ;;  %v366_v55 = vld [vmem:[%s318_s6 + $0x8] sm:$0xf]  ;;  %v367_v57 = vld [vmem:[%s318_s6 + $0xc] sm:$0xf] }
  0x14   : > { %347 = vst.msk [vmem:[#allocation3] sm:$0xff] %vm342_vm1, %v967_v38  ;;  %v1060_v39 = vld [vmem:[#allocation2] sm:$0xff]  ;;  %v625_v56 = vsel %vm585_vm2, %v366_v55, 0  ;;  %v644_v58 = vsel %vm585_vm2, %v367_v57, 0 }
  0x15   : > { %v451_v15 = vsub.f32 1.0, %v450_v14  ;;  %348 = vst.msk [vmem:[#allocation3 + $0x8] sm:$0xff] %vm342_vm1, %v967_v38  ;;  %v1072_v45 = vld [vmem:[#allocation2 + $0x8] sm:$0xff]  ;;  %v364_v59 = vld [vmem:[%s318_s6] sm:$0xf] }
  0x16   : > { %350 = vst.msk [vmem:[#allocation3 + $0x18] sm:$0xff] %vm342_vm1, %v967_v38  ;;  %v587_v60 = vsel %vm585_vm2, %v364_v59, 0  ;;  %v365_v62 = vld [vmem:[%s318_s6 + $0x4] sm:$0xf] }
  0x17   : > { %v452_v16 = vmul.f32 -1e+09, %v451_v15  ;;  %352 = vst.msk [vmem:[#allocation4] sm:$0xff] %vm351_vm0, %v967_v38  ;;  %v1070_v43 = vld [vmem:[#allocation2 + $0x10] sm:$0xff]  ;;  %v606_v0 = vsel %vm585_vm2, %v365_v62, 0 }
  0x18   : > { %873 = vmatmul.msk.bf16.vlgmr.msra.gmra.mxu0 %vm351_vm0, %v356_v8  ;;  %875 = vmatmul.msk.bf16.vlgmr.msra.gmra.mxu2 %vm351_vm0, %v358_v9  ;;  %353 = vst.msk [vmem:[#allocation4 + $0x8] sm:$0xff] %vm351_vm0, %v967_v38  ;;  %v1085_v51 = vld [vmem:[#allocation2 + $0x18] sm:$0xff] }
  0x19   : > { %874 = vmatmul.msk.bf16.vlgmr.msra.gmra.mxu1 %vm351_vm0, %v357_v10  ;;  %876 = vmatmul.msk.bf16.vlgmr.msra.gmra.mxu3 %vm351_vm0, %v359_v11  ;;  %354 = vst.msk [vmem:[#allocation4 + $0x10] sm:$0xff] %vm351_vm0, %v967_v38 }
  0x1a   : > { %355 = vst.msk [vmem:[#allocation4 + $0x18] sm:$0xff] %vm351_vm0, %v967_v38  ;;  %634 = vmatpush.bf16.msrb.mxu2 %v625_v56  ;;  %653 = vmatpush.bf16.msrb.mxu3 %v644_v58 }
  0x1b   : > { %596 = vmatpush.bf16.msrb.mxu0 %v587_v60  ;;  %615 = vmatpush.bf16.msrb.mxu1 %v606_v0 }
  0x95   : > { %v384_v17 = vpop.f32.mrf.mxu0 }
  0x96   : > { %v445_v18 = vmul.f32 0.35355338, %v384_v17  ;;  %v403_v19 = vpop.f32.mrf.mxu1 }
  0x97   : > { %v446_v21 = vmul.f32 0.35355338, %v403_v19 }
  0x98   : > { %v1036_v20 = vadd.f32 %v452_v16, %v445_v18 }
  0x99   : > { %v1040_v25 = vadd.f32 %v452_v16, %v446_v21 }
  0x9a   : > { %v461_v22 = vsel %vm351_vm0, %v1036_v20, -inf }
  0x9b   : > { %v422_v23 = vpop.f32.mrf.mxu2  ;;  %462 = vmax.xlane.f32.xlu1 %v461_v22  ;;  %v464_v32 = vsel %vm351_vm0, %v1040_v25, -inf }
  0x9c   : > { %v447_v24 = vmul.f32 0.35355338, %v422_v23  ;;  %v441_v27 = vpop.f32.mrf.mxu3 }
  0x9d   : > { %v386_v26 = vpop.f32.mrf.mxu0  ;;  %v448_v29 = vmul.f32 0.35355338, %v441_v27 }
  0x9e   : > { %v1042_v28 = vadd.f32 %v452_v16, %v447_v24  ;;  %v405_v30 = vpop.f32.mrf.mxu1 }
  0x9f   : > { %v1048_v33 = vadd.f32 %v452_v16, %v448_v29  ;;  %v523_v30 = vld [vmem:[#allocation3 + $0x10] sm:$0xff] }
  0xa0   : > { %v467_v31 = vsel %vm351_vm0, %v1042_v28, -inf }
  0xa1   : > { %468 = vmax.xlane.f32.xlu0 %v467_v31  ;;  %v470_v36 = vsel %vm351_vm0, %v1048_v33, -inf }
  0xa3   : > { %465 = vmax.xlane.f32.xlu1 %v464_v32  ;;  %v424_v34 = vpop.f32.mrf.mxu2 }
  0xa4   : > { %v443_v35 = vpop.f32.mrf.mxu3 }
  0xa9   : > { %471 = vmax.xlane.f32.xlu0 %v470_v36  ;;  %v521_v36 = vld [vmem:[#allocation3] sm:$0xff] }
 0x10e   : > { %v463_v40 = vpop.xlane.xlu1 %462 }
 0x10f   : > { %v1063_v41 = vmax.f32 %v1060_v39, %v463_v40 }
 0x111   : > { %v477_v42 = vsub.f32 %v1060_v39, %v1063_v41  ;;  %667 = vst.msk [vmem:[#allocation2] sm:$0xff] %vm342_vm1, %v1063_v41  ;;  %491 = vperm.xlu0 %915, %v1063_v41  }
 0x113   : > { %v481_v22 = vmul.f32 1.442695, %v477_v42  ;;  %v522_v42 = vld [vmem:[#allocation3 + $0x8] sm:$0xff] }
 0x114   : > { %v469_v44 = vpop.xlane.xlu0 %468 }
 0x115   : > { %v1075_v46 = vmax.f32 %v1070_v43, %v469_v44 }
 0x116   : > { %v466_v47 = vpop.xlane.xlu1 %465 }
 0x117   : > { %v479_v48 = vsub.f32 %v1070_v43, %v1075_v46  ;;  %669 = vst.msk [vmem:[#allocation2 + $0x10] sm:$0xff] %vm342_vm1, %v1075_v46  ;;  %v474_v49 = vmax.f32 %v1072_v45, %v466_v47  ;;  %501 = vperm.xlu2 %914, %v1075_v46   ;;  %v550_v43 = vld [vmem:[#allocation4] sm:$0xff] }
 0x119   : > { %v478_v50 = vsub.f32 %v1072_v45, %v474_v49  ;;  %668 = vst.msk [vmem:[#allocation2 + $0x8] sm:$0xff] %vm342_vm1, %v474_v49  ;;  %496 = vperm.xlu1 %916, %v474_v49   ;;  %v485_v23 = vmul.f32 1.442695, %v479_v48 }
 0x11b   : > { %v483_v24 = vmul.f32 1.442695, %v478_v50 }
 0x11c   : > { %v472_v52 = vpop.xlane.xlu0 %471 }
 0x11d   : > { %v1088_v53 = vmax.f32 %v1085_v51, %v472_v52 }
 0x11f   : > { %v480_v54 = vsub.f32 %v1085_v51, %v1088_v53  ;;  %670 = vst.msk [vmem:[#allocation2 + $0x18] sm:$0xff] %vm342_vm1, %v1088_v53  ;;  %506 = vperm.xlu2 %914, %v1088_v53  }
 0x121   : > { %v487_v29 = vmul.f32 1.442695, %v480_v54  ;;  %v552_v54 = vld [vmem:[#allocation4 + $0x10] sm:$0xff] }
 0x171   : > { %v502_v61 = vpop.permute.xlu2 %501 }
 0x172   : > { %v511_v63 = vsub.f32 %v1042_v28, %v502_v61 }
 0x174   : > { %v517_v1 = vmul.f32 1.442695, %v511_v63 }
 0x176   : > { %917 = vpow2.f32 %v517_v1  ;;  %v551_v1 = vld [vmem:[#allocation4 + $0x8] sm:$0xff] }
 0x179   : > { %v507_v2 = vpop.permute.xlu2 %506 }
 0x17a   : > { %v512_v3 = vsub.f32 %v1048_v33, %v507_v2 }
 0x17c   : > { %v918_v4 = vpop.eup %917  ;;  %v519_v5 = vmul.f32 1.442695, %v512_v3 }
 0x17d   : > { %v535_v6 = vsel %vm351_vm0, %v918_v4, 0.0  ;;  %v580_v7 = vpack.c.bf16 %v918_v4, %v918_v4 }
 0x17e   : > { %919 = vpow2.f32 %v519_v5  ;;  %536 = vadd.xlane.f32.xlu0 %v535_v6  ;;  %v524_v5 = vld [vmem:[#allocation3 + $0x18] sm:$0xff] }
 0x17f   : > { %879 = vmatmul.msk.bf16.vlgmr.msrb.gmra.mxu2 %vm351_vm0, %v580_v7 }
 0x183   : > { %v492_v8 = vpop.permute.xlu0 %491 }
 0x184   : > { %v920_v9 = vpop.eup %919  ;;  %v509_v10 = vsub.f32 %v1036_v20, %v492_v8 }
 0x185   : > { %v581_v11 = vpack.c.bf16 %v920_v9, %v920_v9  ;;  %v538_v28 = vsel %vm351_vm0, %v920_v9, 0.0  ;;  %v553_v9 = vld [vmem:[#allocation4 + $0x18] sm:$0xff] }
 0x186   : > { %v513_v12 = vmul.f32 1.442695, %v509_v10 }
 0x187   : > { %880 = vmatmul.msk.bf16.vlgmr.msrb.gmra.mxu3 %vm351_vm0, %v581_v11 }
 0x188   : > { %921 = vpow2.f32 %v513_v12 }
 0x18b   : > { %v497_v13 = vpop.permute.xlu1 %496 }
 0x18c   : > { %v510_v14 = vsub.f32 %v1040_v25, %v497_v13 }
 0x18e   : > { %v922_v15 = vpop.eup %921  ;;  %v515_v16 = vmul.f32 1.442695, %v510_v14 }
 0x18f   : > { %v529_v17 = vsel %vm351_vm0, %v922_v15, 0.0  ;;  %v578_v18 = vpack.c.bf16 %v922_v15, %v922_v15 }
 0x190   : > { %923 = vpow2.f32 %v515_v16  ;;  %530 = vadd.xlane.f32.xlu2 %v529_v17 }
 0x191   : > { %877 = vmatmul.msk.bf16.vlgmr.msrb.gmra.mxu0 %vm351_vm0, %v578_v18  ;;  %925 = vpow2.f32 %v481_v22 }
 0x192   : > { %927 = vpow2.f32 %v485_v23 }
 0x193   : > { %929 = vpow2.f32 %v483_v24 }
 0x194   : > { %931 = vpow2.f32 %v487_v29 }
 0x196   : > { %v924_v19 = vpop.eup %923 }
 0x197   : > { %v532_v20 = vsel %vm351_vm0, %v924_v19, 0.0  ;;  %v579_v21 = vpack.c.bf16 %v924_v19, %v924_v19  ;;  %v926_v25 = vpop.eup %925 }
 0x198   : > { %533 = vadd.xlane.f32.xlu1 %v532_v20  ;;  %v928_v26 = vpop.eup %927  ;;  %v525_v39 = vmul.f32 %v926_v25, %v521_v36 }
 0x199   : > { %878 = vmatmul.msk.bf16.vlgmr.msrb.gmra.mxu1 %vm351_vm0, %v579_v21  ;;  %v930_v27 = vpop.eup %929  ;;  %v527_v32 = vmul.f32 %v928_v26, %v523_v30 }
 0x19a   : > { %v932_v31 = vpop.eup %931  ;;  %v526_v46 = vmul.f32 %v930_v27, %v522_v42 }
 0x19b   : > { %v528_v6 = vmul.f32 %v932_v31, %v524_v5 }
 0x1a8   : > { %556 = vperm.xlu2 %914, %v926_v25  }
 0x1b0   : > { %566 = vperm.xlu2 %914, %v928_v26  }
 0x1b1   : > { %561 = vperm.xlu1 %916, %v930_v27  }
 0x1d9   : > { %539 = vadd.xlane.f32.xlu2 %v538_v28 }
 0x1f1   : > { %v537_v33 = vpop.xlane.xlu0 %536  ;;  %571 = vperm.xlu2 %914, %v932_v31  }
 0x1f2   : > { %v543_v34 = vadd.f32 %v537_v33, %v527_v32 }
 0x1f4   : > { %548 = vst.msk [vmem:[#allocation3 + $0x10] sm:$0xff] %vm342_vm1, %v543_v34 }
 0x1fb   : > { %v676_v35 = vld [vmem:[#allocation3 + $0x10] sm:$0xff] }
 0x1fc   : > { %933 = vrcp.f32 %v676_v35 }
 0x202   : > { %v934_v37 = vpop.eup %933  ;;  %v636_v38 = vpop.f32.mrf.mxu2 }
 0x203   : > { %v531_v40 = vpop.xlane.xlu2 %530  ;;  %698 = vperm.xlu1 %916, %v934_v37  }
 0x204   : > { %v541_v41 = vadd.f32 %v531_v40, %v525_v39 }
 0x206   : > { %546 = vst.msk [vmem:[#allocation3] sm:$0xff] %vm342_vm1, %v541_v41 }
 0x20a   : > { %v638_v44 = vpop.f32.mrf.mxu2  ;;  %v655_v45 = vpop.f32.mrf.mxu3 }
 0x20b   : > { %v557_v47 = vpop.permute.xlu2 %556  ;;  %v534_v48 = vpop.xlane.xlu1 %533 }
 0x20c   : > { %v574_v49 = vmul.f32 %v557_v47, %v550_v43  ;;  %v542_v50 = vadd.f32 %v534_v48, %v526_v46 }
 0x20d   : > { %v674_v51 = vld [vmem:[#allocation3] sm:$0xff] }
 0x20e   : > { %547 = vst.msk [vmem:[#allocation3 + $0x8] sm:$0xff] %vm342_vm1, %v542_v50  ;;  %v598_v52 = vpop.f32.mrf.mxu0  ;;  %935 = vrcp.f32 %v674_v51 }
 0x20f   : > { %v659_v53 = vadd.f32 %v598_v52, %v574_v49 }
 0x211   : > { %663 = vst.msk [vmem:[#allocation4] sm:$0xff] %vm351_vm0, %v659_v53 }
 0x212   : > { %v657_v55 = vpop.f32.mrf.mxu3 }
 0x213   : > { %v567_v56 = vpop.permute.xlu2 %566 }
 0x214   : > { %v936_v57 = vpop.eup %935  ;;  %v576_v58 = vmul.f32 %v567_v56, %v552_v54 }
 0x215   : > { %688 = vperm.xlu0 %915, %v936_v57   ;;  %v675_v59 = vld [vmem:[#allocation3 + $0x8] sm:$0xff] }
 0x216   : > { %v661_v60 = vadd.f32 %v636_v38, %v576_v58  ;;  %v600_v61 = vpop.f32.mrf.mxu0  ;;  %v617_v62 = vpop.f32.mrf.mxu1  ;;  %937 = vrcp.f32 %v675_v59 }
 0x218   : > { %665 = vst.msk [vmem:[#allocation4 + $0x10] sm:$0xff] %vm351_vm0, %v661_v60  ;;  %v682_v24 = vld [vmem:[#allocation4] sm:$0xff] }
 0x21c   : > { %v938_v63 = vpop.eup %937 }
 0x21d   : > { %693 = vperm.xlu2 %914, %v938_v63  }
 0x21e   : > { %v619_v0 = vpop.f32.mrf.mxu1 }
 0x21f   : > { %v684_v15 = vld [vmem:[#allocation4 + $0x10] sm:$0xff] }
 0x223   : > { %v562_v2 = vpop.permute.xlu1 %561 }
 0x224   : > { %v575_v3 = vmul.f32 %v562_v2, %v551_v1 }
 0x226   : > { %v660_v4 = vadd.f32 %v617_v62, %v575_v3 }
 0x228   : > { %664 = vst.msk [vmem:[#allocation4 + $0x8] sm:$0xff] %vm351_vm0, %v660_v4 }
 0x22f   : > { %v683_v18 = vld [vmem:[#allocation4 + $0x8] sm:$0xff] }
 0x24c   : > { %v540_v7 = vpop.xlane.xlu2 %539 }
 0x24d   : > { %v544_v8 = vadd.f32 %v540_v7, %v528_v6 }
 0x24f   : > { %549 = vst.msk [vmem:[#allocation3 + $0x18] sm:$0xff] %vm342_vm1, %v544_v8 }
 0x254   : > { %v572_v10 = vpop.permute.xlu2 %571 }
 0x255   : > { %v577_v11 = vmul.f32 %v572_v10, %v553_v9 }
 0x256   : > { %v677_v12 = vld [vmem:[#allocation3 + $0x18] sm:$0xff] }
 0x257   : > { %v662_v13 = vadd.f32 %v655_v45, %v577_v11  ;;  %939 = vrcp.f32 %v677_v12 }
 0x259   : > { %666 = vst.msk [vmem:[#allocation4 + $0x18] sm:$0xff] %vm351_vm0, %v662_v13 }
 0x25d   : > { %v940_v14 = vpop.eup %939 }
 0x25e   : > { %703 = vperm.xlu2 %914, %v940_v14  }
 0x260   : > { %v685_v27 = vld [vmem:[#allocation4 + $0x18] sm:$0xff] }
 0x275   : > { %v699_v16 = vpop.permute.xlu1 %698 }
 0x276   : > { %v708_v17 = vmul.f32 %v699_v16, %v684_v15 }
 0x277   : > { %v694_v19 = vpop.permute.xlu2 %693 }
 0x278   : > { %v712_v20 = vpack.c.bf16 %v708_v17, %v708_v17  ;;  %v707_v21 = vmul.f32 %v694_v19, %v683_v18 }
 0x27a   : > { %717 = vst.msk [vmem:[%s336_s9 + $0x8] sm:$0xf] %vm714_vm3, %v712_v20  ;;  %v711_v22 = vpack.c.bf16 %v707_v21, %v707_v21 }
 0x27c   : > { %716 = vst.msk [vmem:[%s336_s9 + $0x4] sm:$0xf] %vm714_vm3, %v711_v22 }
 0x287   : > { %v689_v23 = vpop.permute.xlu0 %688 }
 0x288   : > { %v706_v25 = vmul.f32 %v689_v23, %v682_v24 }
 0x28a   : > { %v710_v26 = vpack.c.bf16 %v706_v25, %v706_v25 }
 0x28c   : > { %715 = vst.msk [vmem:[%s336_s9] sm:$0xf] %vm714_vm3, %v710_v26 }
 0x2b8   : > { %v704_v28 = vpop.permute.xlu2 %703 }
 0x2b9   : > { %v709_v29 = vmul.f32 %v704_v28, %v685_v27 }
 0x2bb   : > { %v713_v30 = vpack.c.bf16 %v709_v29, %v709_v29 }
 0x2bd   : > { %718 = vst.msk [vmem:[%s336_s9 + $0xc] sm:$0xf] %vm714_vm3, %v713_v30 }
 0x2be PF: > { %s14_s17 = sadd.s32 1, %s963_s17   ;;  %s1147_s15 = smov %s959_s16 }
 0x2bf   : > { %p11_p5 = scmp.ge.s32.totalorder %s14_s17, 4   ;;  %s1148_s16 = smov %s1150_s18 }
 0x2c1   :  { %13 = sbr.rel (!%p11_p5) target bundleno = 2 (0x2), region = 83 }

// kernel: decoder_forward.13
= control target key start
LH: loop header
LB: loop body
LE: loop exit
PB: predicated region body
PF: predicated region fallthrough
CT: control target
= control target key end

     0   :  { %vm19_vm0 = vcmask 523264   ;;  %v99_v1 = vmov 0.0   ;;  %vm43_vm1 = vcmask 261120   ;;  %vm79_vm2 = vcmask 519168   ;;  %s145_s1 = inlined_call_operand.vmem [shape: bf16[32,64], index: 1, kind: input, shape index: {}]   ;;  %s146_s0 = inlined_call_operand.vmem [shape: f32[16,32], index: 0, kind: input, shape index: {}]   ;;  %s147_s2 = inlined_call_operand.vmem [shape: f32[1,64], index: 2, kind: input, shape index: {}]   ;;  %s148_s3 = inlined_call_operand.vmem [shape: bf16[16,64], index: 3, kind: output, shape index: {}]  }
   0x1   :  { %v96_v0 = vld [vmem:[%s145_s1 + $0x8] sm:$0xff]  ;;  %20 = vst.msk [vmem:[#allocation2] sm:$0xff] %vm19_vm0, %v99_v1  ;;  %v95_v2 = vld [vmem:[%s145_s1] sm:$0xff] }
   0x2   :  { %21 = vst.msk [vmem:[#allocation2 + $0x8] sm:$0xff] %vm19_vm0, %v99_v1  ;;  %53 = vmatpush.bf16.msra.mxu0 %v96_v0  ;;  %v24_v3 = vld [vmem:[%s146_s0] sm:$0xff]  ;;  %v25_v4 = vld [vmem:[%s146_s0 + $0x8] sm:$0xff] }
   0x3   :  { %v26_v5 = vpack.c.bf16 %v25_v4, %v24_v3  ;;  %v98_v10 = vld [vmem:[%s147_s2] ss:$0 sm:$0xff] }
   0x6   :  { %54 = vmatpush.bf16.msra.mxu0 %v95_v2 }
   0x8   :  { %v22_v6 = vld [vmem:[#allocation2] sm:$0xff] }
   0x9   :  { %94 = vmatmul.msk.bf16.vlgmr.msra.gmra.mxu0 %vm43_vm1, %v26_v5  ;;  %v23_v9 = vld [vmem:[#allocation2 + $0x8] sm:$0xff] }
  0x86   :  { %v56_v7 = vpop.f32.mrf.mxu0 }
  0x87   :  { %v61_v8 = vadd.f32 %v56_v7, %v22_v6 }
  0x89   :  { %64 = vst.msk [vmem:[#allocation2] sm:$0xff] %vm19_vm0, %v61_v8 }
  0x8e   :  { %v58_v11 = vpop.f32.mrf.mxu0 }
  0x8f   :  { %v62_v12 = vadd.f32 %v58_v11, %v23_v9 }
  0x90   :  { %v69_v13 = vld [vmem:[#allocation2] sm:$0xff] }
  0x91   :  { %v75_v14 = vadd.f32 %v98_v10, %v69_v13  ;;  %65 = vst.msk [vmem:[#allocation2 + $0x8] sm:$0xff] %vm19_vm0, %v62_v12 }
  0x93   :  { %v77_v15 = vpack.c.bf16 %v75_v14, %v75_v14 }
  0x95   :  { %80 = vst.msk [vmem:[%s148_s3] sm:$0xf] %vm79_vm2, %v77_v15 }
  0x98   :  { %v70_v16 = vld [vmem:[#allocation2 + $0x8] sm:$0xff] }
  0x99   :  { %v76_v17 = vadd.f32 %v98_v10, %v70_v16 }
  0x9b   :  { %v78_v18 = vpack.c.bf16 %v76_v17, %v76_v17 }
  0x9d   :  { %81 = vst.msk [vmem:[%s148_s3 + $0x4] sm:$0xf] %vm79_vm2, %v78_v18 }

// kernel: decoder_forward.17
= control target key start
LH: loop header
LB: loop body
LE: loop exit
PB: predicated region body
PF: predicated region fallthrough
CT: control target
= control target key end

     0   :  { %vm20_vm0 = vcmask 408576   ;;  %v140_v1 = vmov 0.0   ;;  %s188_s0 = inlined_call_operand.vmem [shape: f32[16,32], index: 0, kind: input, shape index: {}]   ;;  %s189_s1 = inlined_call_operand.vmem [shape: bf16[32,50], index: 1, kind: input, shape index: {}]   ;;  %s190_s2 = inlined_call_operand.vmem [shape: f32[1,50], index: 2, kind: input, shape index: {}]   ;;  %s191_s3 = inlined_call_operand.hbm [shape: f32[16,50], index: 3, kind: output, shape index: {}]  }
   0x1   :  { %v108_v0 = vld [vmem:[%s189_s1 + $0x8] sm:$0xff]  ;;  %21 = vst.msk [vmem:[#allocation2] sm:$0xff] %vm20_vm0, %v140_v1 }
   0x2   :  { %8 = vsyncpa [#allocation4], 0  ;;  %54 = vmatpush.bf16.msra.mxu0 %v108_v0  ;;  %v107_v2 = vld [vmem:[%s189_s1] sm:$0xff]  ;;  %v26_v4 = vld [vmem:[%s188_s0 + $0x8] sm:$0xff]  ;;  %22 = vst.msk [vmem:[#allocation2 + $0x8] sm:$0xff] %vm20_vm0, %v140_v1  ;;  %vm44_vm1 = vcmask 261120  }
   0x3   :  { %v25_v3 = vld [vmem:[%s188_s0] sm:$0xff]  ;;  %s141_s0 = smov [#allocation3]   ;;  %s86_s24 = sshll.u32 %s191_s3, 4  ;;  %s87_s24 = int_to_ptr.hbm [resolvable:$true] %s86_s24 }
   0x4   :  { %v27_v5 = vpack.c.bf16 %v26_v4, %v25_v3  ;;  %v113_v10 = vld [vmem:[%s190_s2] ss:$0 sm:$0xff]  ;;  %s84_s21 = sshll.u32 %s141_s0, 4  ;;  %s142_s2 = smov 128   ;;  %s85_s21 = int_to_ptr.vmem [resolvable:$true] %s84_s21 }
   0x5   :  { %s143_s25 = smov 8  }
   0x6   :  { %55 = vmatpush.bf16.msra.mxu0 %v107_v2 }
   0x8   :  { %v23_v6 = vld [vmem:[#allocation2] sm:$0xff] }
   0x9   :  { %106 = vmatmul.msk.bf16.vlgmr.msra.gmra.mxu0 %vm44_vm1, %v27_v5  ;;  %v24_v9 = vld [vmem:[#allocation2 + $0x8] sm:$0xff] }
  0x86   :  { %v57_v7 = vpop.f32.mrf.mxu0 }
  0x87   :  { %v62_v8 = vadd.f32 %v57_v7, %v23_v6 }
  0x89   :  { %65 = vst.msk [vmem:[#allocation2] sm:$0xff] %vm20_vm0, %v62_v8 }
  0x8e   :  { %v59_v11 = vpop.f32.mrf.mxu0 }
  0x8f   :  { %v63_v12 = vadd.f32 %v59_v11, %v24_v9 }
  0x90   :  { %v70_v13 = vld [vmem:[#allocation2] sm:$0xff] }
  0x91   :  { %66 = vst.msk [vmem:[#allocation2 + $0x8] sm:$0xff] %vm20_vm0, %v63_v12  ;;  %v76_v14 = vadd.f32 %v113_v10, %v70_v13 }
  0x93   :  { %78 = vst.msk [vmem:[#allocation3] sm:$0xff] %vm20_vm0, %v76_v14 }
  0x98   :  { %v71_v15 = vld [vmem:[#allocation2 + $0x8] sm:$0xff] }
  0x99   :  { %v77_v16 = vadd.f32 %v113_v10, %v71_v15 }
  0x9b   :  { %79 = vst.msk [vmem:[#allocation3 + $0x8] sm:$0xff] %vm20_vm0, %v77_v16 }
  0x9c   :  { %92 = dma.vmem_to_hbm [thread:$0]  %s85_s21, 256, %s87_s24, [#allocation4], %s142_s2, %s142_s2, %s143_s25  }
  0x9d   :  { %138 = dma.done.wait [#allocation4], 256  }
  0x9e   :  { %139 = vsyncadd [#allocation4], 4294967040 }
  0x9f   :  { %97 = vsyncpa [#allocation4], 1 }

// kernel: decoder_forward.16
= control target key start
LH: loop header
LB: loop body
LE: loop exit
PB: predicated region body
PF: predicated region fallthrough
CT: control target
= control target key end

     0   :  { %vm31_vm0 = vcmask 261120   ;;  %v262_v9 = vmov 0.0   ;;  %vm112_vm1 = vcmask 523264   ;;  %v263_v33 = vmov 32.0   ;;  %s357_s1 = inlined_call_operand.vmem [shape: bf16[32,64], index: 1, kind: input, shape index: {}]   ;;  %s358_s0 = inlined_call_operand.vmem [shape: f32[16,32], index: 0, kind: input, shape index: {}]   ;;  %s359_s2 = inlined_call_operand.vmem [shape: f32[1,64], index: 2, kind: input, shape index: {}]   ;;  %s360_s3 = inlined_call_operand.vmem [shape: bf16[64,32], index: 3, kind: input, shape index: {}]   ;;  %s361_s4 = inlined_call_operand.vmem [shape: f32[1,32], index: 4, kind: input, shape index: {}]   ;;  %s362_s5 = inlined_call_operand.vmem [shape: f32[1,32], index: 5, kind: input, shape index: {}]   ;;  %s363_s6 = inlined_call_operand.vmem [shape: f32[1,32], index: 6, kind: input, shape index: {}]   ;;  %s364_s7 = inlined_call_operand.vmem [shape: f32[16,32], index: 7, kind: output, shape index: {}]  }
   0x1   :  { %v245_v0 = vld [vmem:[%s357_s1 + $0x8] sm:$0xff]  ;;  %v244_v1 = vld [vmem:[%s357_s1] sm:$0xff]  ;;  %v249_v5 = vld [vmem:[%s360_s3 + $0x18] sm:$0xff]  ;;  %32 = vst.msk [vmem:[#allocation2] sm:$0xff] %vm31_vm0, %v262_v9  ;;  %256 = vrcp.f32 %v263_v33 }
   0x2   :  { %67 = vmatpush.bf16.msra.mxu0 %v245_v0  ;;  %v34_v2 = vld [vmem:[%s358_s0] sm:$0xff]  ;;  %v35_v3 = vld [vmem:[%s358_s0 + $0x8] sm:$0xff]  ;;  %120 = vmatpush.bf16.msra.mxu1 %v249_v5  ;;  %v248_v6 = vld [vmem:[%s360_s3 + $0x10] sm:$0xff]  ;;  %33 = vst.msk [vmem:[#allocation2 + $0x8] sm:$0xff] %vm31_vm0, %v262_v9 }
   0x3   :  { %v36_v4 = vpack.c.bf16 %v35_v3, %v34_v2  ;;  %v247_v7 = vld [vmem:[%s360_s3 + $0x8] sm:$0xff]  ;;  %v246_v8 = vld [vmem:[%s360_s3] sm:$0xff] }
   0x4   :  { %v252_v11 = vld [vmem:[%s359_s2] ss:$0 sm:$0xff] }
   0x5   :  { %v253_v22 = vld [vmem:[%s361_s4] ss:$0 sm:$0xff] }
   0x6   :  { %68 = vmatpush.bf16.msra.mxu0 %v244_v1  ;;  %121 = vmatpush.bf16.msra.mxu1 %v248_v6  ;;  %v254_v0 = vld [vmem:[%s362_s5] ss:$0 sm:$0xff] }
   0x7   :  { %v257_v34 = vpop.eup %256 }
   0x8   :  { %v77_v18 = vld [vmem:[#allocation2] sm:$0xff]  ;;  %v156_v35 = vmul.f32 32.0, %v257_v34  ;;  %vm160_vm2 = vweird.f32 %v257_v34 }
   0x9   :  { %226 = vmatmul.msk.bf16.vlgmr.msra.gmra.mxu0 %vm31_vm0, %v36_v4  ;;  %v78_v21 = vld [vmem:[#allocation2 + $0x8] sm:$0xff] }
   0xa   :  { %122 = vmatpush.bf16.msra.mxu1 %v247_v7  ;;  %v157_v36 = vsub.f32 1.0, %v156_v35 }
   0xc   :  { %v158_v37 = vmul.f32 %v257_v34, %v157_v36 }
   0xe   :  { %123 = vmatpush.bf16.msra.mxu1 %v246_v8  ;;  %v159_v38 = vadd.f32 %v257_v34, %v158_v37 }
  0x10   :  { %v161_v39 = vsel %vm160_vm2, %v257_v34, %v159_v38 }
  0x86   :  { %v70_v10 = vpop.f32.mrf.mxu0 }
  0x87   :  { %v71_v12 = vadd.f32 %v252_v11, %v70_v10 }
  0x89   :  { %v75_v15 = vmax.f32 %v71_v12, 0.0 }
  0x8e   :  { %v72_v13 = vpop.f32.mrf.mxu0 }
  0x8f   :  { %v73_v14 = vadd.f32 %v252_v11, %v72_v13 }
  0x91   :  { %v76_v16 = vmax.f32 %v73_v14, 0.0 }
  0x93   :  { %v79_v17 = vpack.c.bf16 %v76_v16, %v75_v15 }
  0x95   :  { %243 = vmatmul.msk.bf16.vlgmr.msra.gmra.mxu1 %vm112_vm1, %v79_v17 }
 0x112   :  { %v125_v19 = vpop.f32.mrf.mxu1 }
 0x113   :  { %v130_v20 = vadd.f32 %v125_v19, %v77_v18 }
 0x115   :  { %132 = vst.msk [vmem:[#allocation2] sm:$0xff] %vm31_vm0, %v130_v20 }
 0x11a   :  { %v127_v23 = vpop.f32.mrf.mxu1 }
 0x11b   :  { %v131_v24 = vadd.f32 %v127_v23, %v78_v21 }
 0x11c   :  { %v137_v25 = vld [vmem:[#allocation2] sm:$0xff] }
 0x11d   :  { %133 = vst.msk [vmem:[#allocation2 + $0x8] sm:$0xff] %vm31_vm0, %v131_v24  ;;  %v143_v26 = vadd.f32 %v253_v22, %v137_v25 }
 0x11f   :  { %v147_v27 = vadd.f32 %v143_v26, %v34_v2 }
 0x121   :  { %v149_v28 = vsel %vm31_vm0, %v147_v27, 0.0 }
 0x122   :  { %150 = vadd.xlane.f32.xlu0 %v149_v28 }
 0x124   :  { %v138_v29 = vld [vmem:[#allocation2 + $0x8] sm:$0xff] }
 0x125   :  { %v144_v30 = vadd.f32 %v253_v22, %v138_v29 }
 0x127   :  { %v148_v31 = vadd.f32 %v144_v30, %v35_v3  ;;  %v255_v3 = vld [vmem:[%s363_s6] ss:$0 sm:$0xff] }
 0x129   :  { %v152_v32 = vsel %vm31_vm0, %v148_v31, 0.0 }
 0x12a   :  { %153 = vadd.xlane.f32.xlu0 %v152_v32 }
 0x195   :  { %v151_v40 = vpop.xlane.xlu0 %150 }
 0x196   :  { %v162_v41 = vmul.f32 %v161_v39, %v151_v40 }
 0x198   :  { %v164_v42 = vsub.f32 %v147_v27, %v162_v41 }
 0x19a   :  { %v166_v43 = vmul.f32 %v164_v42, %v164_v42 }
 0x19c   :  { %v168_v44 = vsel %vm31_vm0, %v166_v43, 0.0 }
 0x19d   :  { %169 = vadd.xlane.f32.xlu1 %v168_v44  ;;  %v154_v45 = vpop.xlane.xlu0 %153 }
 0x19e   :  { %v163_v46 = vmul.f32 %v161_v39, %v154_v45 }
 0x1a0   :  { %v165_v47 = vsub.f32 %v148_v31, %v163_v46 }
 0x1a2   :  { %v167_v48 = vmul.f32 %v165_v47, %v165_v47 }
 0x1a4   :  { %v171_v49 = vsel %vm31_vm0, %v167_v48, 0.0 }
 0x1a5   :  { %172 = vadd.xlane.f32.xlu1 %v171_v49 }
 0x210   :  { %v170_v50 = vpop.xlane.xlu1 %169 }
 0x211   :  { %v174_v51 = vmul.f32 %v170_v50, %v161_v39 }
 0x213   :  { %v176_v52 = vadd.f32 1e-05, %v174_v51 }
 0x215   :  { %258 = vrsqrt.f32 %v176_v52  ;;  %vm184_vm4 = vweird.f32 %v176_v52 }
 0x218   :  { %v173_v53 = vpop.xlane.xlu1 %172 }
 0x219   :  { %v175_v54 = vmul.f32 %v173_v53, %v161_v39 }
 0x21b   :  { %v259_v55 = vpop.eup %258  ;;  %v177_v56 = vadd.f32 1e-05, %v175_v54 }
 0x21c   :  { %v179_v57 = vmul.f32 %v259_v55, %v176_v52  ;;  %vm185_vm3 = vweird.f32 %v259_v55 }
 0x21d   :  { %260 = vrsqrt.f32 %v177_v56  ;;  %vm186_vm5 = vmor %vm184_vm4, %vm185_vm3  ;;  %vm194_vm7 = vweird.f32 %v177_v56 }
 0x21e   :  { %v180_v58 = vmul.f32 %v259_v55, %v179_v57 }
 0x220   :  { %v181_v59 = vmul.f32 0.5, %v180_v58 }
 0x222   :  { %v182_v60 = vsub.f32 1.5, %v181_v59 }
 0x223   :  { %v261_v61 = vpop.eup %260 }
 0x224   :  { %v183_v62 = vmul.f32 %v259_v55, %v182_v60  ;;  %v189_v63 = vmul.f32 %v261_v61, %v177_v56  ;;  %vm195_vm6 = vweird.f32 %v261_v61 }
 0x225   :  { %vm196_vm8 = vmor %vm194_vm7, %vm195_vm6 }
 0x226   :  { %v187_v1 = vsel %vm186_vm5, %v259_v55, %v183_v62  ;;  %v190_v2 = vmul.f32 %v261_v61, %v189_v63 }
 0x227   :  { %v198_v4 = vmul.f32 %v187_v1, %v164_v42 }
 0x228   :  { %v191_v5 = vmul.f32 0.5, %v190_v2 }
 0x229   :  { %v204_v6 = vmul.f32 %v254_v0, %v198_v4 }
 0x22a   :  { %v192_v7 = vsub.f32 1.5, %v191_v5 }
 0x22b   :  { %v210_v8 = vadd.f32 %v255_v3, %v204_v6 }
 0x22c   :  { %v193_v9 = vmul.f32 %v261_v61, %v192_v7 }
 0x22d   :  { %212 = vst.msk [vmem:[%s364_s7] sm:$0xff] %vm31_vm0, %v210_v8 }
 0x22e   :  { %v197_v10 = vsel %vm196_vm8, %v261_v61, %v193_v9 }
 0x22f   :  { %v199_v11 = vmul.f32 %v197_v10, %v165_v47 }
 0x231   :  { %v205_v12 = vmul.f32 %v254_v0, %v199_v11 }
 0x233   :  { %v211_v13 = vadd.f32 %v255_v3, %v205_v12 }
 0x235   :  { %213 = vst.msk [vmem:[%s364_s7 + $0x8] sm:$0xff] %vm31_vm0, %v211_v13 }

</bundles_post_ra>
